<compile_context>
chip_gen: v7x
topology: tpu7x:2x2x1
jax: 0.10.0
libtpu: 0.0.40
codegen_flags: <defaults>
</compile_context>

<pallas_src>
import jax
import jax.numpy as jnp
from jax.experimental import pallas as pl
from jax.experimental.pallas import tpu as pltpu


def _make_lstm_stack_kernel(num_layers, Tc, B, H, last_chunk, last_s):
    """Fused kernel: all LSTM layers + FC head, one time chunk per grid step."""

    def kernel(*refs):
        x_ref = refs[0]                               # (Tc*B, I) input chunk
        layer_refs = refs[1:1 + 3 * num_layers]       # (wih_t, whh_t, b) per layer
        fc_w_ref = refs[1 + 3 * num_layers]           # (H, O)
        fc_b_ref = refs[2 + 3 * num_layers]           # (1, O)
        out_ref = refs[3 + 3 * num_layers]            # (B, O)
        h_scr = refs[4 + 3 * num_layers]              # (L, B, H) carried state
        c_scr = refs[5 + 3 * num_layers]              # (L, B, H) carried state

        chunk = pl.program_id(0)

        @pl.when(chunk == 0)
        def _():
            h_scr[...] = jnp.zeros_like(h_scr)
            c_scr[...] = jnp.zeros_like(c_scr)

        layer_in = x_ref[...]                         # (Tc*B, I_l)
        hs = None
        for l in range(num_layers):
            wih = layer_refs[3 * l][...]              # (I_l, 4H)
            whh = layer_refs[3 * l + 1][...]          # (H, 4H)
            b = layer_refs[3 * l + 2][...]            # (1, 4H)

            # Hoisted input projection for the whole chunk (one MXU matmul,
            # bias folded in once instead of per-step).
            xproj = jnp.dot(layer_in, wih,
                            preferred_element_type=jnp.float32) + b   # (Tc*B, 4H)

            h = h_scr[l]                              # (B, H)
            c = c_scr[l]                              # (B, H)
            hs = []
            # Sequential recurrence: small h @ W_hh matmul + gate elementwise
            # per step; fully unrolled (Tc is static and small).
            for s in range(Tc):
                gates = xproj[s * B:(s + 1) * B, :] + jnp.dot(
                    h, whh, preferred_element_type=jnp.float32)        # (B, 4H)
                # Two whole-slab EUP passes; slice the needed gates out.
                sig = jax.nn.sigmoid(gates)
                tah = jnp.tanh(gates)
                i_g = sig[:, 0 * H:1 * H]
                f_g = sig[:, 1 * H:2 * H]
                g_g = tah[:, 2 * H:3 * H]
                o_g = sig[:, 3 * H:4 * H]
                c = f_g * c + i_g * g_g
                h = o_g * jnp.tanh(c)
                hs.append(h)
            h_scr[l] = h
            c_scr[l] = c
            if l < num_layers - 1:
                # Hidden sequence of this chunk feeds the next layer directly
                # from VMEM-resident values (no HBM round-trip).
                layer_in = jnp.concatenate(hs, axis=0)   # (Tc*B, H)

        # Fused FC head on the chunk containing the true last timestep.
        h_last = hs[last_s]                            # (B, H)

        @pl.when(chunk == last_chunk)
        def _():
            out_ref[...] = (
                jnp.dot(h_last, fc_w_ref[...],
                        preferred_element_type=jnp.float32) + fc_b_ref[...]
            ).astype(out_ref.dtype)

    return kernel


def _choose_tc(T, B):
    """Time-chunk size: amortize grid overhead; keep (Tc*B) sublane-aligned."""
    Tc = min(T, 32)
    # With multiple chunks, the (Tc*B, ...) block's second-to-last dim must be
    # a multiple of 8 (sublane count).  A single full-extent chunk is exempt.
    while Tc < T and (Tc * B) % 8 != 0:
        Tc += 1
    return Tc


@jax.jit
def lstm_model_forward(params, x):
    # Mirror: if len(x.size()) == 2: x = x.unsqueeze(1)
    if x.ndim == 2:
        x = x[:, None, :]
    B, T, I = x.shape
    x_tbi = jnp.transpose(x, (1, 0, 2)).astype(jnp.float32)    # (T, B, I)

    Tc = _choose_tc(T, B)
    num_chunks = -(-T // Tc)
    Tp = num_chunks * Tc
    if Tp != T:
        # Pad at the end; padded steps occur after the captured last-valid
        # timestep, so they never affect the FC-head input.
        x_tbi = jnp.pad(x_tbi, ((0, Tp - T), (0, 0), (0, 0)))
    x2d = x_tbi.reshape(Tp * B, I)                              # (Tp*B, I)

    last_chunk = (T - 1) // Tc
    last_s = (T - 1) % Tc

    num_layers = len(params["layers"])
    H = params["layers"][0]["whh_t"].shape[0]
    O = params["fc_w_t"].shape[1]

    kernel = _make_lstm_stack_kernel(num_layers, Tc, B, H, last_chunk, last_s)

    in_specs = [pl.BlockSpec((Tc * B, I), lambda t: (t, 0))]
    inputs = [x2d]
    for lp in params["layers"]:
        in_specs += [
            pl.BlockSpec(lp["wih_t"].shape, lambda t: (0, 0)),
            pl.BlockSpec(lp["whh_t"].shape, lambda t: (0, 0)),
            pl.BlockSpec(lp["b"].shape, lambda t: (0, 0)),
        ]
        inputs += [lp["wih_t"], lp["whh_t"], lp["b"]]
    in_specs += [
        pl.BlockSpec(params["fc_w_t"].shape, lambda t: (0, 0)),
        pl.BlockSpec(params["fc_b"].shape, lambda t: (0, 0)),
    ]
    inputs += [params["fc_w_t"], params["fc_b"]]

    out = pl.pallas_call(
        kernel,
        out_shape=jax.ShapeDtypeStruct((B, O), jnp.float32),
        grid_spec=pltpu.PrefetchScalarGridSpec(
            num_scalar_prefetch=0,
            grid=(num_chunks,),
            in_specs=in_specs,
            out_specs=pl.BlockSpec((B, O), lambda t: (0, 0)),
            scratch_shapes=[
                pltpu.VMEM((num_layers, B, H), jnp.float32),    # h state
                pltpu.VMEM((num_layers, B, H), jnp.float32),    # c state
            ],
        ),
        compiler_params=pltpu.CompilerParams(
            dimension_semantics=("arbitrary",)),                # time is a carry
    )(*inputs)
    return jnp.squeeze(out)                                     # mirror out.squeeze()


def init_lstm_model_params(key, input_size, hidden_size, num_layers, output_size):
    """Deterministic init mimicking PyTorch's uniform(-1/sqrt(H), 1/sqrt(H))."""
    k = 1.0 / jnp.sqrt(jnp.float32(hidden_size))
    params = {"layers": []}
    for layer in range(num_layers):
        in_sz = input_size if layer == 0 else hidden_size
        key, k1, k2, k3, k4 = jax.random.split(key, 5)
        wih = jax.random.uniform(k1, (4 * hidden_size, in_sz), jnp.float32, -k, k)
        whh = jax.random.uniform(k2, (4 * hidden_size, hidden_size), jnp.float32, -k, k)
        bih = jax.random.uniform(k3, (4 * hidden_size,), jnp.float32, -k, k)
        bhh = jax.random.uniform(k4, (4 * hidden_size,), jnp.float32, -k, k)
        params["layers"].append({
            "wih_t": wih.T,                                # (in, 4H)
            "whh_t": whh.T,                                # (H, 4H)
            "b": (bih + bhh).reshape(1, 4 * hidden_size),  # (1, 4H)
        })
    key, k1, k2 = jax.random.split(key, 3)
    kf = 1.0 / jnp.sqrt(jnp.float32(hidden_size))
    wfc = jax.random.uniform(k1, (output_size, hidden_size), jnp.float32, -kf, kf)
    bfc = jax.random.uniform(k2, (output_size,), jnp.float32, -kf, kf)
    params["fc_w_t"] = wfc.T                      # (H, O)
    params["fc_b"] = bfc.reshape(1, output_size)  # (1, O)
    return params


def reference_forward(params, x):
    """Pure-JAX reference for validation."""
    if x.ndim == 2:
        x = x[:, None, :]
    x_tbi = jnp.transpose(x, (1, 0, 2)).astype(jnp.float32)
    for lp in params["layers"]:
        T, B, _ = x_tbi.shape
        H = lp["whh_t"].shape[0]
        h = jnp.zeros((B, H), jnp.float32)
        c = jnp.zeros((B, H), jnp.float32)
        outs = []
        for t in range(T):
            gates = x_tbi[t] @ lp["wih_t"] + h @ lp["whh_t"] + lp["b"]
            i_g = jax.nn.sigmoid(gates[:, 0 * H:1 * H])
            f_g = jax.nn.sigmoid(gates[:, 1 * H:2 * H])
            g_g = jnp.tanh(gates[:, 2 * H:3 * H])
            o_g = jax.nn.sigmoid(gates[:, 3 * H:4 * H])
            c = f_g * c + i_g * g_g
            h = o_g * jnp.tanh(c)
            outs.append(h)
        x_tbi = jnp.stack(outs, axis=0)
    out = x_tbi[-1] @ params["fc_w_t"] + params["fc_b"]
    return jnp.squeeze(out)


if __name__ == "__main__":
    input_size, hidden_size, num_layers, output_size = 16, 32, 2, 4
    batch, seq_len = 2, 8

    key = jax.random.PRNGKey(0)
    key, pkey, xkey = jax.random.split(key, 3)
    params = init_lstm_model_params(pkey, input_size, hidden_size, num_layers,
                                    output_size)
    x = jax.random.normal(xkey, (batch, seq_len, input_size), jnp.float32)

    out = lstm_model_forward(params, x)
    out = jax.block_until_ready(out)

    ref = reference_forward(params, x)
    assert out.shape == ref.shape, (out.shape, ref.shape)
    assert jnp.allclose(out, ref, atol=1e-4, rtol=1e-4), (
        "mismatch", float(jnp.max(jnp.abs(out - ref))))

    print("KERNEL_OK")
</pallas_src>

<mosaic_0001>
module attributes {stable_mosaic.version = 11 : i64} {
  func.func @kernel(%arg0: i32, %arg1: memref<16x16xf32, #tpu.memory_space<vmem>>, %arg2: memref<16x128xf32, #tpu.memory_space<vmem>>, %arg3: memref<32x128xf32, #tpu.memory_space<vmem>>, %arg4: memref<1x128xf32, #tpu.memory_space<vmem>>, %arg5: memref<32x128xf32, #tpu.memory_space<vmem>>, %arg6: memref<32x128xf32, #tpu.memory_space<vmem>>, %arg7: memref<1x128xf32, #tpu.memory_space<vmem>>, %arg8: memref<32x4xf32, #tpu.memory_space<vmem>>, %arg9: memref<1x4xf32, #tpu.memory_space<vmem>>, %arg10: memref<2x4xf32, #tpu.memory_space<vmem>>, %arg11: memref<2x2x32xf32, #tpu.memory_space<vmem>>, %arg12: memref<2x2x32xf32, #tpu.memory_space<vmem>>) attributes {dimension_semantics = [#tpu.dimension_semantics<arbitrary>], iteration_bounds = array<i64: 1>, scalar_prefetch = 0 : i64, scratch_operands = 2 : i64, tpu.core_type = #tpu.core_type<tc>, window_params = [{transform_indices = @transform_0, window_bounds = array<i64: 16, 16>}, {pipeline_mode = #tpu.pipeline_mode<synchronous>, transform_indices = @transform_1, window_bounds = array<i64: 16, 128>}, {pipeline_mode = #tpu.pipeline_mode<synchronous>, transform_indices = @transform_2, window_bounds = array<i64: 32, 128>}, {pipeline_mode = #tpu.pipeline_mode<synchronous>, transform_indices = @transform_3, window_bounds = array<i64: 1, 128>}, {pipeline_mode = #tpu.pipeline_mode<synchronous>, transform_indices = @transform_4, window_bounds = array<i64: 32, 128>}, {pipeline_mode = #tpu.pipeline_mode<synchronous>, transform_indices = @transform_5, window_bounds = array<i64: 32, 128>}, {pipeline_mode = #tpu.pipeline_mode<synchronous>, transform_indices = @transform_6, window_bounds = array<i64: 1, 128>}, {pipeline_mode = #tpu.pipeline_mode<synchronous>, transform_indices = @transform_7, window_bounds = array<i64: 32, 4>}, {pipeline_mode = #tpu.pipeline_mode<synchronous>, transform_indices = @transform_8, window_bounds = array<i64: 1, 4>}, {pipeline_mode = #tpu.pipeline_mode<synchronous>, transform_indices = @transform_9, window_bounds = array<i64: 2, 4>}]} {
    %c0_i32 = arith.constant 0 : i32
    %0 = arith.cmpi eq, %arg0, %c0_i32 : i32
    %1 = arith.extui %0 : i1 to i32
    %c0_i32_0 = arith.constant 0 : i32
    %2 = arith.cmpi ne, %1, %c0_i32_0 : i32
    scf.if %2 {
      %cst_72 = arith.constant 0.000000e+00 : f32
      %328 = vector.broadcast %cst_72 : f32 to vector<2x2x32xf32>
      %c0_73 = arith.constant 0 : index
      %c0_74 = arith.constant 0 : index
      %c0_75 = arith.constant 0 : index
      %329 = vector.load %arg11[%c0_73, %c0_74, %c0_75] : memref<2x2x32xf32, #tpu.memory_space<vmem>>, vector<2x2x32xf32>
      tpu.vector_store %arg11[%c0_73, %c0_74, %c0_75], %328 {strides = array<i32>} : memref<2x2x32xf32, #tpu.memory_space<vmem>>, vector<2x2x32xf32>,
      %cst_76 = arith.constant 0.000000e+00 : f32
      %330 = vector.broadcast %cst_76 : f32 to vector<2x2x32xf32>
      %c0_77 = arith.constant 0 : index
      %c0_78 = arith.constant 0 : index
      %c0_79 = arith.constant 0 : index
      %331 = vector.load %arg12[%c0_77, %c0_78, %c0_79] : memref<2x2x32xf32, #tpu.memory_space<vmem>>, vector<2x2x32xf32>
      tpu.vector_store %arg12[%c0_77, %c0_78, %c0_79], %330 {strides = array<i32>} : memref<2x2x32xf32, #tpu.memory_space<vmem>>, vector<2x2x32xf32>,
    } else {
    }
    %c0 = arith.constant 0 : index
    %c0_1 = arith.constant 0 : index
    %3 = vector.load %arg1[%c0, %c0_1] : memref<16x16xf32, #tpu.memory_space<vmem>>, vector<16x16xf32>
    %c0_2 = arith.constant 0 : index
    %c0_3 = arith.constant 0 : index
    %4 = vector.load %arg2[%c0_2, %c0_3] : memref<16x128xf32, #tpu.memory_space<vmem>>, vector<16x128xf32>
    %c0_4 = arith.constant 0 : index
    %c0_5 = arith.constant 0 : index
    %5 = vector.load %arg3[%c0_4, %c0_5] : memref<32x128xf32, #tpu.memory_space<vmem>>, vector<32x128xf32>
    %c0_6 = arith.constant 0 : index
    %c0_7 = arith.constant 0 : index
    %6 = vector.load %arg4[%c0_6, %c0_7] : memref<1x128xf32, #tpu.memory_space<vmem>>, vector<1x128xf32>
    %cst = arith.constant dense<0.000000e+00> : vector<16x128xf32>
    %7 = tpu.matmul %3, %4, %cst {dimension_numbers = #tpu.dot_dimension_numbers<[1], [0], [0], [1], [0, 0, 1, 1], [], []>} : vector<16x16xf32>, vector<16x128xf32>, vector<16x128xf32> -> vector<16x128xf32>
    %8 = vector.broadcast %6 : vector<1x128xf32> to vector<16x128xf32>
    %9 = arith.addf %7, %8 : vector<16x128xf32>
    %c0_8 = arith.constant 0 : index
    %c0_9 = arith.constant 0 : index
    %c0_10 = arith.constant 0 : index
    %10 = vector.load %arg11[%c0_8, %c0_9, %c0_10] : memref<2x2x32xf32, #tpu.memory_space<vmem>>, vector<1x2x32xf32>
    %11 = vector.shape_cast %10 : vector<1x2x32xf32> to vector<2x32xf32>
    %c0_11 = arith.constant 0 : index
    %c0_12 = arith.constant 0 : index
    %c0_13 = arith.constant 0 : index
    %12 = vector.load %arg12[%c0_11, %c0_12, %c0_13] : memref<2x2x32xf32, #tpu.memory_space<vmem>>, vector<1x2x32xf32>
    %13 = vector.shape_cast %12 : vector<1x2x32xf32> to vector<2x32xf32>
    %14 = vector.extract_strided_slice %9 {offsets = [0, 0], sizes = [2, 128], strides = [1, 1]} : vector<16x128xf32> to vector<2x128xf32>
    %cst_14 = arith.constant dense<0.000000e+00> : vector<2x128xf32>
    %15 = tpu.matmul %11, %5, %cst_14 {dimension_numbers = #tpu.dot_dimension_numbers<[1], [0], [0], [1], [0, 0, 1, 1], [], []>} : vector<2x32xf32>, vector<32x128xf32>, vector<2x128xf32> -> vector<2x128xf32>
    %16 = arith.addf %14, %15 : vector<2x128xf32>
    %17 = arith.negf %16 : vector<2x128xf32>
    %18 = math.exp %17 : vector<2x128xf32>
    %cst_15 = arith.constant 1.000000e+00 : f32
    %19 = vector.broadcast %cst_15 : f32 to vector<2x128xf32>
    %20 = arith.addf %19, %18 : vector<2x128xf32>
    %21 = arith.divf %19, %20 : vector<2x128xf32>
    %22 = math.tanh %16 : vector<2x128xf32>
    %23 = vector.extract_strided_slice %21 {offsets = [0, 0], sizes = [2, 32], strides = [1, 1]} : vector<2x128xf32> to vector<2x32xf32>
    %24 = vector.extract_strided_slice %21 {offsets = [0, 32], sizes = [2, 32], strides = [1, 1]} : vector<2x128xf32> to vector<2x32xf32>
    %25 = vector.extract_strided_slice %22 {offsets = [0, 64], sizes = [2, 32], strides = [1, 1]} : vector<2x128xf32> to vector<2x32xf32>
    %26 = vector.extract_strided_slice %21 {offsets = [0, 96], sizes = [2, 32], strides = [1, 1]} : vector<2x128xf32> to vector<2x32xf32>
    %27 = arith.mulf %24, %13 : vector<2x32xf32>
    %28 = arith.mulf %23, %25 : vector<2x32xf32>
    %29 = arith.addf %27, %28 : vector<2x32xf32>
    %30 = math.tanh %29 : vector<2x32xf32>
    %31 = arith.mulf %26, %30 : vector<2x32xf32>
    %32 = vector.extract_strided_slice %9 {offsets = [2, 0], sizes = [2, 128], strides = [1, 1]} : vector<16x128xf32> to vector<2x128xf32>
    %cst_16 = arith.constant dense<0.000000e+00> : vector<2x128xf32>
    %33 = tpu.matmul %31, %5, %cst_16 {dimension_numbers = #tpu.dot_dimension_numbers<[1], [0], [0], [1], [0, 0, 1, 1], [], []>} : vector<2x32xf32>, vector<32x128xf32>, vector<2x128xf32> -> vector<2x128xf32>
    %34 = arith.addf %32, %33 : vector<2x128xf32>
    %35 = arith.negf %34 : vector<2x128xf32>
    %36 = math.exp %35 : vector<2x128xf32>
    %cst_17 = arith.constant 1.000000e+00 : f32
    %37 = vector.broadcast %cst_17 : f32 to vector<2x128xf32>
    %38 = arith.addf %37, %36 : vector<2x128xf32>
    %39 = arith.divf %37, %38 : vector<2x128xf32>
    %40 = math.tanh %34 : vector<2x128xf32>
    %41 = vector.extract_strided_slice %39 {offsets = [0, 0], sizes = [2, 32], strides = [1, 1]} : vector<2x128xf32> to vector<2x32xf32>
    %42 = vector.extract_strided_slice %39 {offsets = [0, 32], sizes = [2, 32], strides = [1, 1]} : vector<2x128xf32> to vector<2x32xf32>
    %43 = vector.extract_strided_slice %40 {offsets = [0, 64], sizes = [2, 32], strides = [1, 1]} : vector<2x128xf32> to vector<2x32xf32>
    %44 = vector.extract_strided_slice %39 {offsets = [0, 96], sizes = [2, 32], strides = [1, 1]} : vector<2x128xf32> to vector<2x32xf32>
    %45 = arith.mulf %42, %29 : vector<2x32xf32>
    %46 = arith.mulf %41, %43 : vector<2x32xf32>
    %47 = arith.addf %45, %46 : vector<2x32xf32>
    %48 = math.tanh %47 : vector<2x32xf32>
    %49 = arith.mulf %44, %48 : vector<2x32xf32>
    %50 = vector.extract_strided_slice %9 {offsets = [4, 0], sizes = [2, 128], strides = [1, 1]} : vector<16x128xf32> to vector<2x128xf32>
    %cst_18 = arith.constant dense<0.000000e+00> : vector<2x128xf32>
    %51 = tpu.matmul %49, %5, %cst_18 {dimension_numbers = #tpu.dot_dimension_numbers<[1], [0], [0], [1], [0, 0, 1, 1], [], []>} : vector<2x32xf32>, vector<32x128xf32>, vector<2x128xf32> -> vector<2x128xf32>
    %52 = arith.addf %50, %51 : vector<2x128xf32>
    %53 = arith.negf %52 : vector<2x128xf32>
    %54 = math.exp %53 : vector<2x128xf32>
    %cst_19 = arith.constant 1.000000e+00 : f32
    %55 = vector.broadcast %cst_19 : f32 to vector<2x128xf32>
    %56 = arith.addf %55, %54 : vector<2x128xf32>
    %57 = arith.divf %55, %56 : vector<2x128xf32>
    %58 = math.tanh %52 : vector<2x128xf32>
    %59 = vector.extract_strided_slice %57 {offsets = [0, 0], sizes = [2, 32], strides = [1, 1]} : vector<2x128xf32> to vector<2x32xf32>
    %60 = vector.extract_strided_slice %57 {offsets = [0, 32], sizes = [2, 32], strides = [1, 1]} : vector<2x128xf32> to vector<2x32xf32>
    %61 = vector.extract_strided_slice %58 {offsets = [0, 64], sizes = [2, 32], strides = [1, 1]} : vector<2x128xf32> to vector<2x32xf32>
    %62 = vector.extract_strided_slice %57 {offsets = [0, 96], sizes = [2, 32], strides = [1, 1]} : vector<2x128xf32> to vector<2x32xf32>
    %63 = arith.mulf %60, %47 : vector<2x32xf32>
    %64 = arith.mulf %59, %61 : vector<2x32xf32>
    %65 = arith.addf %63, %64 : vector<2x32xf32>
    %66 = math.tanh %65 : vector<2x32xf32>
    %67 = arith.mulf %62, %66 : vector<2x32xf32>
    %68 = vector.extract_strided_slice %9 {offsets = [6, 0], sizes = [2, 128], strides = [1, 1]} : vector<16x128xf32> to vector<2x128xf32>
    %cst_20 = arith.constant dense<0.000000e+00> : vector<2x128xf32>
    %69 = tpu.matmul %67, %5, %cst_20 {dimension_numbers = #tpu.dot_dimension_numbers<[1], [0], [0], [1], [0, 0, 1, 1], [], []>} : vector<2x32xf32>, vector<32x128xf32>, vector<2x128xf32> -> vector<2x128xf32>
    %70 = arith.addf %68, %69 : vector<2x128xf32>
    %71 = arith.negf %70 : vector<2x128xf32>
    %72 = math.exp %71 : vector<2x128xf32>
    %cst_21 = arith.constant 1.000000e+00 : f32
    %73 = vector.broadcast %cst_21 : f32 to vector<2x128xf32>
    %74 = arith.addf %73, %72 : vector<2x128xf32>
    %75 = arith.divf %73, %74 : vector<2x128xf32>
    %76 = math.tanh %70 : vector<2x128xf32>
    %77 = vector.extract_strided_slice %75 {offsets = [0, 0], sizes = [2, 32], strides = [1, 1]} : vector<2x128xf32> to vector<2x32xf32>
    %78 = vector.extract_strided_slice %75 {offsets = [0, 32], sizes = [2, 32], strides = [1, 1]} : vector<2x128xf32> to vector<2x32xf32>
    %79 = vector.extract_strided_slice %76 {offsets = [0, 64], sizes = [2, 32], strides = [1, 1]} : vector<2x128xf32> to vector<2x32xf32>
    %80 = vector.extract_strided_slice %75 {offsets = [0, 96], sizes = [2, 32], strides = [1, 1]} : vector<2x128xf32> to vector<2x32xf32>
    %81 = arith.mulf %78, %65 : vector<2x32xf32>
    %82 = arith.mulf %77, %79 : vector<2x32xf32>
    %83 = arith.addf %81, %82 : vector<2x32xf32>
    %84 = math.tanh %83 : vector<2x32xf32>
    %85 = arith.mulf %80, %84 : vector<2x32xf32>
    %86 = vector.extract_strided_slice %9 {offsets = [8, 0], sizes = [2, 128], strides = [1, 1]} : vector<16x128xf32> to vector<2x128xf32>
    %cst_22 = arith.constant dense<0.000000e+00> : vector<2x128xf32>
    %87 = tpu.matmul %85, %5, %cst_22 {dimension_numbers = #tpu.dot_dimension_numbers<[1], [0], [0], [1], [0, 0, 1, 1], [], []>} : vector<2x32xf32>, vector<32x128xf32>, vector<2x128xf32> -> vector<2x128xf32>
    %88 = arith.addf %86, %87 : vector<2x128xf32>
    %89 = arith.negf %88 : vector<2x128xf32>
    %90 = math.exp %89 : vector<2x128xf32>
    %cst_23 = arith.constant 1.000000e+00 : f32
    %91 = vector.broadcast %cst_23 : f32 to vector<2x128xf32>
    %92 = arith.addf %91, %90 : vector<2x128xf32>
    %93 = arith.divf %91, %92 : vector<2x128xf32>
    %94 = math.tanh %88 : vector<2x128xf32>
    %95 = vector.extract_strided_slice %93 {offsets = [0, 0], sizes = [2, 32], strides = [1, 1]} : vector<2x128xf32> to vector<2x32xf32>
    %96 = vector.extract_strided_slice %93 {offsets = [0, 32], sizes = [2, 32], strides = [1, 1]} : vector<2x128xf32> to vector<2x32xf32>
    %97 = vector.extract_strided_slice %94 {offsets = [0, 64], sizes = [2, 32], strides = [1, 1]} : vector<2x128xf32> to vector<2x32xf32>
    %98 = vector.extract_strided_slice %93 {offsets = [0, 96], sizes = [2, 32], strides = [1, 1]} : vector<2x128xf32> to vector<2x32xf32>
    %99 = arith.mulf %96, %83 : vector<2x32xf32>
    %100 = arith.mulf %95, %97 : vector<2x32xf32>
    %101 = arith.addf %99, %100 : vector<2x32xf32>
    %102 = math.tanh %101 : vector<2x32xf32>
    %103 = arith.mulf %98, %102 : vector<2x32xf32>
    %104 = vector.extract_strided_slice %9 {offsets = [10, 0], sizes = [2, 128], strides = [1, 1]} : vector<16x128xf32> to vector<2x128xf32>
    %cst_24 = arith.constant dense<0.000000e+00> : vector<2x128xf32>
    %105 = tpu.matmul %103, %5, %cst_24 {dimension_numbers = #tpu.dot_dimension_numbers<[1], [0], [0], [1], [0, 0, 1, 1], [], []>} : vector<2x32xf32>, vector<32x128xf32>, vector<2x128xf32> -> vector<2x128xf32>
    %106 = arith.addf %104, %105 : vector<2x128xf32>
    %107 = arith.negf %106 : vector<2x128xf32>
    %108 = math.exp %107 : vector<2x128xf32>
    %cst_25 = arith.constant 1.000000e+00 : f32
    %109 = vector.broadcast %cst_25 : f32 to vector<2x128xf32>
    %110 = arith.addf %109, %108 : vector<2x128xf32>
    %111 = arith.divf %109, %110 : vector<2x128xf32>
    %112 = math.tanh %106 : vector<2x128xf32>
    %113 = vector.extract_strided_slice %111 {offsets = [0, 0], sizes = [2, 32], strides = [1, 1]} : vector<2x128xf32> to vector<2x32xf32>
    %114 = vector.extract_strided_slice %111 {offsets = [0, 32], sizes = [2, 32], strides = [1, 1]} : vector<2x128xf32> to vector<2x32xf32>
    %115 = vector.extract_strided_slice %112 {offsets = [0, 64], sizes = [2, 32], strides = [1, 1]} : vector<2x128xf32> to vector<2x32xf32>
    %116 = vector.extract_strided_slice %111 {offsets = [0, 96], sizes = [2, 32], strides = [1, 1]} : vector<2x128xf32> to vector<2x32xf32>
    %117 = arith.mulf %114, %101 : vector<2x32xf32>
    %118 = arith.mulf %113, %115 : vector<2x32xf32>
    %119 = arith.addf %117, %118 : vector<2x32xf32>
    %120 = math.tanh %119 : vector<2x32xf32>
    %121 = arith.mulf %116, %120 : vector<2x32xf32>
    %122 = vector.extract_strided_slice %9 {offsets = [12, 0], sizes = [2, 128], strides = [1, 1]} : vector<16x128xf32> to vector<2x128xf32>
    %cst_26 = arith.constant dense<0.000000e+00> : vector<2x128xf32>
    %123 = tpu.matmul %121, %5, %cst_26 {dimension_numbers = #tpu.dot_dimension_numbers<[1], [0], [0], [1], [0, 0, 1, 1], [], []>} : vector<2x32xf32>, vector<32x128xf32>, vector<2x128xf32> -> vector<2x128xf32>
    %124 = arith.addf %122, %123 : vector<2x128xf32>
    %125 = arith.negf %124 : vector<2x128xf32>
    %126 = math.exp %125 : vector<2x128xf32>
    %cst_27 = arith.constant 1.000000e+00 : f32
    %127 = vector.broadcast %cst_27 : f32 to vector<2x128xf32>
    %128 = arith.addf %127, %126 : vector<2x128xf32>
    %129 = arith.divf %127, %128 : vector<2x128xf32>
    %130 = math.tanh %124 : vector<2x128xf32>
    %131 = vector.extract_strided_slice %129 {offsets = [0, 0], sizes = [2, 32], strides = [1, 1]} : vector<2x128xf32> to vector<2x32xf32>
    %132 = vector.extract_strided_slice %129 {offsets = [0, 32], sizes = [2, 32], strides = [1, 1]} : vector<2x128xf32> to vector<2x32xf32>
    %133 = vector.extract_strided_slice %130 {offsets = [0, 64], sizes = [2, 32], strides = [1, 1]} : vector<2x128xf32> to vector<2x32xf32>
    %134 = vector.extract_strided_slice %129 {offsets = [0, 96], sizes = [2, 32], strides = [1, 1]} : vector<2x128xf32> to vector<2x32xf32>
    %135 = arith.mulf %132, %119 : vector<2x32xf32>
    %136 = arith.mulf %131, %133 : vector<2x32xf32>
    %137 = arith.addf %135, %136 : vector<2x32xf32>
    %138 = math.tanh %137 : vector<2x32xf32>
    %139 = arith.mulf %134, %138 : vector<2x32xf32>
    %140 = vector.extract_strided_slice %9 {offsets = [14, 0], sizes = [2, 128], strides = [1, 1]} : vector<16x128xf32> to vector<2x128xf32>
    %cst_28 = arith.constant dense<0.000000e+00> : vector<2x128xf32>
    %141 = tpu.matmul %139, %5, %cst_28 {dimension_numbers = #tpu.dot_dimension_numbers<[1], [0], [0], [1], [0, 0, 1, 1], [], []>} : vector<2x32xf32>, vector<32x128xf32>, vector<2x128xf32> -> vector<2x128xf32>
    %142 = arith.addf %140, %141 : vector<2x128xf32>
    %143 = arith.negf %142 : vector<2x128xf32>
    %144 = math.exp %143 : vector<2x128xf32>
    %cst_29 = arith.constant 1.000000e+00 : f32
    %145 = vector.broadcast %cst_29 : f32 to vector<2x128xf32>
    %146 = arith.addf %145, %144 : vector<2x128xf32>
    %147 = arith.divf %145, %146 : vector<2x128xf32>
    %148 = math.tanh %142 : vector<2x128xf32>
    %149 = vector.extract_strided_slice %147 {offsets = [0, 0], sizes = [2, 32], strides = [1, 1]} : vector<2x128xf32> to vector<2x32xf32>
    %150 = vector.extract_strided_slice %147 {offsets = [0, 32], sizes = [2, 32], strides = [1, 1]} : vector<2x128xf32> to vector<2x32xf32>
    %151 = vector.extract_strided_slice %148 {offsets = [0, 64], sizes = [2, 32], strides = [1, 1]} : vector<2x128xf32> to vector<2x32xf32>
    %152 = vector.extract_strided_slice %147 {offsets = [0, 96], sizes = [2, 32], strides = [1, 1]} : vector<2x128xf32> to vector<2x32xf32>
    %153 = arith.mulf %150, %137 : vector<2x32xf32>
    %154 = arith.mulf %149, %151 : vector<2x32xf32>
    %155 = arith.addf %153, %154 : vector<2x32xf32>
    %156 = math.tanh %155 : vector<2x32xf32>
    %157 = arith.mulf %152, %156 : vector<2x32xf32>
    %c0_30 = arith.constant 0 : index
    %c0_31 = arith.constant 0 : index
    %c0_32 = arith.constant 0 : index
    %158 = vector.load %arg11[%c0_30, %c0_31, %c0_32] : memref<2x2x32xf32, #tpu.memory_space<vmem>>, vector<1x2x32xf32>
    %159 = vector.shape_cast %158 : vector<1x2x32xf32> to vector<2x32xf32>
    %160 = vector.shape_cast %157 : vector<2x32xf32> to vector<1x2x32xf32>
    tpu.vector_store %arg11[%c0_30, %c0_31, %c0_32], %160 {strides = array<i32>} : memref<2x2x32xf32, #tpu.memory_space<vmem>>, vector<1x2x32xf32>,
    %c0_33 = arith.constant 0 : index
    %c0_34 = arith.constant 0 : index
    %c0_35 = arith.constant 0 : index
    %161 = vector.load %arg12[%c0_33, %c0_34, %c0_35] : memref<2x2x32xf32, #tpu.memory_space<vmem>>, vector<1x2x32xf32>
    %162 = vector.shape_cast %161 : vector<1x2x32xf32> to vector<2x32xf32>
    %163 = vector.shape_cast %155 : vector<2x32xf32> to vector<1x2x32xf32>
    tpu.vector_store %arg12[%c0_33, %c0_34, %c0_35], %163 {strides = array<i32>} : memref<2x2x32xf32, #tpu.memory_space<vmem>>, vector<1x2x32xf32>,
    %164 = tpu.concatenate %31, %49, %67, %85, %103, %121, %139, %157 in 0 : vector<2x32xf32>, vector<2x32xf32>, vector<2x32xf32>, vector<2x32xf32>, vector<2x32xf32>, vector<2x32xf32>, vector<2x32xf32>, vector<2x32xf32> -> vector<16x32xf32>
    %c0_36 = arith.constant 0 : index
    %c0_37 = arith.constant 0 : index
    %165 = vector.load %arg5[%c0_36, %c0_37] : memref<32x128xf32, #tpu.memory_space<vmem>>, vector<32x128xf32>
    %c0_38 = arith.constant 0 : index
    %c0_39 = arith.constant 0 : index
    %166 = vector.load %arg6[%c0_38, %c0_39] : memref<32x128xf32, #tpu.memory_space<vmem>>, vector<32x128xf32>
    %c0_40 = arith.constant 0 : index
    %c0_41 = arith.constant 0 : index
    %167 = vector.load %arg7[%c0_40, %c0_41] : memref<1x128xf32, #tpu.memory_space<vmem>>, vector<1x128xf32>
    %cst_42 = arith.constant dense<0.000000e+00> : vector<16x128xf32>
    %168 = tpu.matmul %164, %165, %cst_42 {dimension_numbers = #tpu.dot_dimension_numbers<[1], [0], [0], [1], [0, 0, 1, 1], [], []>} : vector<16x32xf32>, vector<32x128xf32>, vector<16x128xf32> -> vector<16x128xf32>
    %169 = vector.broadcast %167 : vector<1x128xf32> to vector<16x128xf32>
    %170 = arith.addf %168, %169 : vector<16x128xf32>
    %c1 = arith.constant 1 : index
    %c0_43 = arith.constant 0 : index
    %c0_44 = arith.constant 0 : index
    %171 = vector.load %arg11[%c1, %c0_43, %c0_44] : memref<2x2x32xf32, #tpu.memory_space<vmem>>, vector<1x2x32xf32>
    %172 = vector.shape_cast %171 : vector<1x2x32xf32> to vector<2x32xf32>
    %c1_45 = arith.constant 1 : index
    %c0_46 = arith.constant 0 : index
    %c0_47 = arith.constant 0 : index
    %173 = vector.load %arg12[%c1_45, %c0_46, %c0_47] : memref<2x2x32xf32, #tpu.memory_space<vmem>>, vector<1x2x32xf32>
    %174 = vector.shape_cast %173 : vector<1x2x32xf32> to vector<2x32xf32>
    %175 = vector.extract_strided_slice %170 {offsets = [0, 0], sizes = [2, 128], strides = [1, 1]} : vector<16x128xf32> to vector<2x128xf32>
    %cst_48 = arith.constant dense<0.000000e+00> : vector<2x128xf32>
    %176 = tpu.matmul %172, %166, %cst_48 {dimension_numbers = #tpu.dot_dimension_numbers<[1], [0], [0], [1], [0, 0, 1, 1], [], []>} : vector<2x32xf32>, vector<32x128xf32>, vector<2x128xf32> -> vector<2x128xf32>
    %177 = arith.addf %175, %176 : vector<2x128xf32>
    %178 = arith.negf %177 : vector<2x128xf32>
    %179 = math.exp %178 : vector<2x128xf32>
    %cst_49 = arith.constant 1.000000e+00 : f32
    %180 = vector.broadcast %cst_49 : f32 to vector<2x128xf32>
    %181 = arith.addf %180, %179 : vector<2x128xf32>
    %182 = arith.divf %180, %181 : vector<2x128xf32>
    %183 = math.tanh %177 : vector<2x128xf32>
    %184 = vector.extract_strided_slice %182 {offsets = [0, 0], sizes = [2, 32], strides = [1, 1]} : vector<2x128xf32> to vector<2x32xf32>
    %185 = vector.extract_strided_slice %182 {offsets = [0, 32], sizes = [2, 32], strides = [1, 1]} : vector<2x128xf32> to vector<2x32xf32>
    %186 = vector.extract_strided_slice %183 {offsets = [0, 64], sizes = [2, 32], strides = [1, 1]} : vector<2x128xf32> to vector<2x32xf32>
    %187 = vector.extract_strided_slice %182 {offsets = [0, 96], sizes = [2, 32], strides = [1, 1]} : vector<2x128xf32> to vector<2x32xf32>
    %188 = arith.mulf %185, %174 : vector<2x32xf32>
    %189 = arith.mulf %184, %186 : vector<2x32xf32>
    %190 = arith.addf %188, %189 : vector<2x32xf32>
    %191 = math.tanh %190 : vector<2x32xf32>
    %192 = arith.mulf %187, %191 : vector<2x32xf32>
    %193 = vector.extract_strided_slice %170 {offsets = [2, 0], sizes = [2, 128], strides = [1, 1]} : vector<16x128xf32> to vector<2x128xf32>
    %cst_50 = arith.constant dense<0.000000e+00> : vector<2x128xf32>
    %194 = tpu.matmul %192, %166, %cst_50 {dimension_numbers = #tpu.dot_dimension_numbers<[1], [0], [0], [1], [0, 0, 1, 1], [], []>} : vector<2x32xf32>, vector<32x128xf32>, vector<2x128xf32> -> vector<2x128xf32>
    %195 = arith.addf %193, %194 : vector<2x128xf32>
    %196 = arith.negf %195 : vector<2x128xf32>
    %197 = math.exp %196 : vector<2x128xf32>
    %cst_51 = arith.constant 1.000000e+00 : f32
    %198 = vector.broadcast %cst_51 : f32 to vector<2x128xf32>
    %199 = arith.addf %198, %197 : vector<2x128xf32>
    %200 = arith.divf %198, %199 : vector<2x128xf32>
    %201 = math.tanh %195 : vector<2x128xf32>
    %202 = vector.extract_strided_slice %200 {offsets = [0, 0], sizes = [2, 32], strides = [1, 1]} : vector<2x128xf32> to vector<2x32xf32>
    %203 = vector.extract_strided_slice %200 {offsets = [0, 32], sizes = [2, 32], strides = [1, 1]} : vector<2x128xf32> to vector<2x32xf32>
    %204 = vector.extract_strided_slice %201 {offsets = [0, 64], sizes = [2, 32], strides = [1, 1]} : vector<2x128xf32> to vector<2x32xf32>
    %205 = vector.extract_strided_slice %200 {offsets = [0, 96], sizes = [2, 32], strides = [1, 1]} : vector<2x128xf32> to vector<2x32xf32>
    %206 = arith.mulf %203, %190 : vector<2x32xf32>
    %207 = arith.mulf %202, %204 : vector<2x32xf32>
    %208 = arith.addf %206, %207 : vector<2x32xf32>
    %209 = math.tanh %208 : vector<2x32xf32>
    %210 = arith.mulf %205, %209 : vector<2x32xf32>
    %211 = vector.extract_strided_slice %170 {offsets = [4, 0], sizes = [2, 128], strides = [1, 1]} : vector<16x128xf32> to vector<2x128xf32>
    %cst_52 = arith.constant dense<0.000000e+00> : vector<2x128xf32>
    %212 = tpu.matmul %210, %166, %cst_52 {dimension_numbers = #tpu.dot_dimension_numbers<[1], [0], [0], [1], [0, 0, 1, 1], [], []>} : vector<2x32xf32>, vector<32x128xf32>, vector<2x128xf32> -> vector<2x128xf32>
    %213 = arith.addf %211, %212 : vector<2x128xf32>
    %214 = arith.negf %213 : vector<2x128xf32>
    %215 = math.exp %214 : vector<2x128xf32>
    %cst_53 = arith.constant 1.000000e+00 : f32
    %216 = vector.broadcast %cst_53 : f32 to vector<2x128xf32>
    %217 = arith.addf %216, %215 : vector<2x128xf32>
    %218 = arith.divf %216, %217 : vector<2x128xf32>
    %219 = math.tanh %213 : vector<2x128xf32>
    %220 = vector.extract_strided_slice %218 {offsets = [0, 0], sizes = [2, 32], strides = [1, 1]} : vector<2x128xf32> to vector<2x32xf32>
    %221 = vector.extract_strided_slice %218 {offsets = [0, 32], sizes = [2, 32], strides = [1, 1]} : vector<2x128xf32> to vector<2x32xf32>
    %222 = vector.extract_strided_slice %219 {offsets = [0, 64], sizes = [2, 32], strides = [1, 1]} : vector<2x128xf32> to vector<2x32xf32>
    %223 = vector.extract_strided_slice %218 {offsets = [0, 96], sizes = [2, 32], strides = [1, 1]} : vector<2x128xf32> to vector<2x32xf32>
    %224 = arith.mulf %221, %208 : vector<2x32xf32>
    %225 = arith.mulf %220, %222 : vector<2x32xf32>
    %226 = arith.addf %224, %225 : vector<2x32xf32>
    %227 = math.tanh %226 : vector<2x32xf32>
    %228 = arith.mulf %223, %227 : vector<2x32xf32>
    %229 = vector.extract_strided_slice %170 {offsets = [6, 0], sizes = [2, 128], strides = [1, 1]} : vector<16x128xf32> to vector<2x128xf32>
    %cst_54 = arith.constant dense<0.000000e+00> : vector<2x128xf32>
    %230 = tpu.matmul %228, %166, %cst_54 {dimension_numbers = #tpu.dot_dimension_numbers<[1], [0], [0], [1], [0, 0, 1, 1], [], []>} : vector<2x32xf32>, vector<32x128xf32>, vector<2x128xf32> -> vector<2x128xf32>
    %231 = arith.addf %229, %230 : vector<2x128xf32>
    %232 = arith.negf %231 : vector<2x128xf32>
    %233 = math.exp %232 : vector<2x128xf32>
    %cst_55 = arith.constant 1.000000e+00 : f32
    %234 = vector.broadcast %cst_55 : f32 to vector<2x128xf32>
    %235 = arith.addf %234, %233 : vector<2x128xf32>
    %236 = arith.divf %234, %235 : vector<2x128xf32>
    %237 = math.tanh %231 : vector<2x128xf32>
    %238 = vector.extract_strided_slice %236 {offsets = [0, 0], sizes = [2, 32], strides = [1, 1]} : vector<2x128xf32> to vector<2x32xf32>
    %239 = vector.extract_strided_slice %236 {offsets = [0, 32], sizes = [2, 32], strides = [1, 1]} : vector<2x128xf32> to vector<2x32xf32>
    %240 = vector.extract_strided_slice %237 {offsets = [0, 64], sizes = [2, 32], strides = [1, 1]} : vector<2x128xf32> to vector<2x32xf32>
    %241 = vector.extract_strided_slice %236 {offsets = [0, 96], sizes = [2, 32], strides = [1, 1]} : vector<2x128xf32> to vector<2x32xf32>
    %242 = arith.mulf %239, %226 : vector<2x32xf32>
    %243 = arith.mulf %238, %240 : vector<2x32xf32>
    %244 = arith.addf %242, %243 : vector<2x32xf32>
    %245 = math.tanh %244 : vector<2x32xf32>
    %246 = arith.mulf %241, %245 : vector<2x32xf32>
    %247 = vector.extract_strided_slice %170 {offsets = [8, 0], sizes = [2, 128], strides = [1, 1]} : vector<16x128xf32> to vector<2x128xf32>
    %cst_56 = arith.constant dense<0.000000e+00> : vector<2x128xf32>
    %248 = tpu.matmul %246, %166, %cst_56 {dimension_numbers = #tpu.dot_dimension_numbers<[1], [0], [0], [1], [0, 0, 1, 1], [], []>} : vector<2x32xf32>, vector<32x128xf32>, vector<2x128xf32> -> vector<2x128xf32>
    %249 = arith.addf %247, %248 : vector<2x128xf32>
    %250 = arith.negf %249 : vector<2x128xf32>
    %251 = math.exp %250 : vector<2x128xf32>
    %cst_57 = arith.constant 1.000000e+00 : f32
    %252 = vector.broadcast %cst_57 : f32 to vector<2x128xf32>
    %253 = arith.addf %252, %251 : vector<2x128xf32>
    %254 = arith.divf %252, %253 : vector<2x128xf32>
    %255 = math.tanh %249 : vector<2x128xf32>
    %256 = vector.extract_strided_slice %254 {offsets = [0, 0], sizes = [2, 32], strides = [1, 1]} : vector<2x128xf32> to vector<2x32xf32>
    %257 = vector.extract_strided_slice %254 {offsets = [0, 32], sizes = [2, 32], strides = [1, 1]} : vector<2x128xf32> to vector<2x32xf32>
    %258 = vector.extract_strided_slice %255 {offsets = [0, 64], sizes = [2, 32], strides = [1, 1]} : vector<2x128xf32> to vector<2x32xf32>
    %259 = vector.extract_strided_slice %254 {offsets = [0, 96], sizes = [2, 32], strides = [1, 1]} : vector<2x128xf32> to vector<2x32xf32>
    %260 = arith.mulf %257, %244 : vector<2x32xf32>
    %261 = arith.mulf %256, %258 : vector<2x32xf32>
    %262 = arith.addf %260, %261 : vector<2x32xf32>
    %263 = math.tanh %262 : vector<2x32xf32>
    %264 = arith.mulf %259, %263 : vector<2x32xf32>
    %265 = vector.extract_strided_slice %170 {offsets = [10, 0], sizes = [2, 128], strides = [1, 1]} : vector<16x128xf32> to vector<2x128xf32>
    %cst_58 = arith.constant dense<0.000000e+00> : vector<2x128xf32>
    %266 = tpu.matmul %264, %166, %cst_58 {dimension_numbers = #tpu.dot_dimension_numbers<[1], [0], [0], [1], [0, 0, 1, 1], [], []>} : vector<2x32xf32>, vector<32x128xf32>, vector<2x128xf32> -> vector<2x128xf32>
    %267 = arith.addf %265, %266 : vector<2x128xf32>
    %268 = arith.negf %267 : vector<2x128xf32>
    %269 = math.exp %268 : vector<2x128xf32>
    %cst_59 = arith.constant 1.000000e+00 : f32
    %270 = vector.broadcast %cst_59 : f32 to vector<2x128xf32>
    %271 = arith.addf %270, %269 : vector<2x128xf32>
    %272 = arith.divf %270, %271 : vector<2x128xf32>
    %273 = math.tanh %267 : vector<2x128xf32>
    %274 = vector.extract_strided_slice %272 {offsets = [0, 0], sizes = [2, 32], strides = [1, 1]} : vector<2x128xf32> to vector<2x32xf32>
    %275 = vector.extract_strided_slice %272 {offsets = [0, 32], sizes = [2, 32], strides = [1, 1]} : vector<2x128xf32> to vector<2x32xf32>
    %276 = vector.extract_strided_slice %273 {offsets = [0, 64], sizes = [2, 32], strides = [1, 1]} : vector<2x128xf32> to vector<2x32xf32>
    %277 = vector.extract_strided_slice %272 {offsets = [0, 96], sizes = [2, 32], strides = [1, 1]} : vector<2x128xf32> to vector<2x32xf32>
    %278 = arith.mulf %275, %262 : vector<2x32xf32>
    %279 = arith.mulf %274, %276 : vector<2x32xf32>
    %280 = arith.addf %278, %279 : vector<2x32xf32>
    %281 = math.tanh %280 : vector<2x32xf32>
    %282 = arith.mulf %277, %281 : vector<2x32xf32>
    %283 = vector.extract_strided_slice %170 {offsets = [12, 0], sizes = [2, 128], strides = [1, 1]} : vector<16x128xf32> to vector<2x128xf32>
    %cst_60 = arith.constant dense<0.000000e+00> : vector<2x128xf32>
    %284 = tpu.matmul %282, %166, %cst_60 {dimension_numbers = #tpu.dot_dimension_numbers<[1], [0], [0], [1], [0, 0, 1, 1], [], []>} : vector<2x32xf32>, vector<32x128xf32>, vector<2x128xf32> -> vector<2x128xf32>
    %285 = arith.addf %283, %284 : vector<2x128xf32>
    %286 = arith.negf %285 : vector<2x128xf32>
    %287 = math.exp %286 : vector<2x128xf32>
    %cst_61 = arith.constant 1.000000e+00 : f32
    %288 = vector.broadcast %cst_61 : f32 to vector<2x128xf32>
    %289 = arith.addf %288, %287 : vector<2x128xf32>
    %290 = arith.divf %288, %289 : vector<2x128xf32>
    %291 = math.tanh %285 : vector<2x128xf32>
    %292 = vector.extract_strided_slice %290 {offsets = [0, 0], sizes = [2, 32], strides = [1, 1]} : vector<2x128xf32> to vector<2x32xf32>
    %293 = vector.extract_strided_slice %290 {offsets = [0, 32], sizes = [2, 32], strides = [1, 1]} : vector<2x128xf32> to vector<2x32xf32>
    %294 = vector.extract_strided_slice %291 {offsets = [0, 64], sizes = [2, 32], strides = [1, 1]} : vector<2x128xf32> to vector<2x32xf32>
    %295 = vector.extract_strided_slice %290 {offsets = [0, 96], sizes = [2, 32], strides = [1, 1]} : vector<2x128xf32> to vector<2x32xf32>
    %296 = arith.mulf %293, %280 : vector<2x32xf32>
    %297 = arith.mulf %292, %294 : vector<2x32xf32>
    %298 = arith.addf %296, %297 : vector<2x32xf32>
    %299 = math.tanh %298 : vector<2x32xf32>
    %300 = arith.mulf %295, %299 : vector<2x32xf32>
    %301 = vector.extract_strided_slice %170 {offsets = [14, 0], sizes = [2, 128], strides = [1, 1]} : vector<16x128xf32> to vector<2x128xf32>
    %cst_62 = arith.constant dense<0.000000e+00> : vector<2x128xf32>
    %302 = tpu.matmul %300, %166, %cst_62 {dimension_numbers = #tpu.dot_dimension_numbers<[1], [0], [0], [1], [0, 0, 1, 1], [], []>} : vector<2x32xf32>, vector<32x128xf32>, vector<2x128xf32> -> vector<2x128xf32>
    %303 = arith.addf %301, %302 : vector<2x128xf32>
    %304 = arith.negf %303 : vector<2x128xf32>
    %305 = math.exp %304 : vector<2x128xf32>
    %cst_63 = arith.constant 1.000000e+00 : f32
    %306 = vector.broadcast %cst_63 : f32 to vector<2x128xf32>
    %307 = arith.addf %306, %305 : vector<2x128xf32>
    %308 = arith.divf %306, %307 : vector<2x128xf32>
    %309 = math.tanh %303 : vector<2x128xf32>
    %310 = vector.extract_strided_slice %308 {offsets = [0, 0], sizes = [2, 32], strides = [1, 1]} : vector<2x128xf32> to vector<2x32xf32>
    %311 = vector.extract_strided_slice %308 {offsets = [0, 32], sizes = [2, 32], strides = [1, 1]} : vector<2x128xf32> to vector<2x32xf32>
    %312 = vector.extract_strided_slice %309 {offsets = [0, 64], sizes = [2, 32], strides = [1, 1]} : vector<2x128xf32> to vector<2x32xf32>
    %313 = vector.extract_strided_slice %308 {offsets = [0, 96], sizes = [2, 32], strides = [1, 1]} : vector<2x128xf32> to vector<2x32xf32>
    %314 = arith.mulf %311, %298 : vector<2x32xf32>
    %315 = arith.mulf %310, %312 : vector<2x32xf32>
    %316 = arith.addf %314, %315 : vector<2x32xf32>
    %317 = math.tanh %316 : vector<2x32xf32>
    %318 = arith.mulf %313, %317 : vector<2x32xf32>
    %c1_64 = arith.constant 1 : index
    %c0_65 = arith.constant 0 : index
    %c0_66 = arith.constant 0 : index
    %319 = vector.load %arg11[%c1_64, %c0_65, %c0_66] : memref<2x2x32xf32, #tpu.memory_space<vmem>>, vector<1x2x32xf32>
    %320 = vector.shape_cast %319 : vector<1x2x32xf32> to vector<2x32xf32>
    %321 = vector.shape_cast %318 : vector<2x32xf32> to vector<1x2x32xf32>
    tpu.vector_store %arg11[%c1_64, %c0_65, %c0_66], %321 {strides = array<i32>} : memref<2x2x32xf32, #tpu.memory_space<vmem>>, vector<1x2x32xf32>,
    %c1_67 = arith.constant 1 : index
    %c0_68 = arith.constant 0 : index
    %c0_69 = arith.constant 0 : index
    %322 = vector.load %arg12[%c1_67, %c0_68, %c0_69] : memref<2x2x32xf32, #tpu.memory_space<vmem>>, vector<1x2x32xf32>
    %323 = vector.shape_cast %322 : vector<1x2x32xf32> to vector<2x32xf32>
    %324 = vector.shape_cast %316 : vector<2x32xf32> to vector<1x2x32xf32>
    tpu.vector_store %arg12[%c1_67, %c0_68, %c0_69], %324 {strides = array<i32>} : memref<2x2x32xf32, #tpu.memory_space<vmem>>, vector<1x2x32xf32>,
    %c0_i32_70 = arith.constant 0 : i32
    %325 = arith.cmpi eq, %arg0, %c0_i32_70 : i32
    %326 = arith.extui %325 : i1 to i32
    %c0_i32_71 = arith.constant 0 : i32
    %327 = arith.cmpi ne, %326, %c0_i32_71 : i32
    scf.if %327 {
      %c0_72 = arith.constant 0 : index
      %c0_73 = arith.constant 0 : index
      %328 = vector.load %arg8[%c0_72, %c0_73] : memref<32x4xf32, #tpu.memory_space<vmem>>, vector<32x4xf32>
      %cst_74 = arith.constant dense<0.000000e+00> : vector<2x4xf32>
      %329 = tpu.matmul %318, %328, %cst_74 {dimension_numbers = #tpu.dot_dimension_numbers<[1], [0], [0], [1], [0, 0, 1, 1], [], []>} : vector<2x32xf32>, vector<32x4xf32>, vector<2x4xf32> -> vector<2x4xf32>
      %c0_75 = arith.constant 0 : index
      %c0_76 = arith.constant 0 : index
      %330 = vector.load %arg9[%c0_75, %c0_76] : memref<1x4xf32, #tpu.memory_space<vmem>>, vector<1x4xf32>
      %331 = vector.broadcast %330 : vector<1x4xf32> to vector<2x4xf32>
      %332 = arith.addf %329, %331 : vector<2x4xf32>
      %c0_77 = arith.constant 0 : index
      %c0_78 = arith.constant 0 : index
      %333 = vector.load %arg10[%c0_77, %c0_78] : memref<2x4xf32, #tpu.memory_space<vmem>>, vector<2x4xf32>
      tpu.vector_store %arg10[%c0_77, %c0_78], %332 {strides = array<i32>} : memref<2x4xf32, #tpu.memory_space<vmem>>, vector<2x4xf32>,
    } else {
    }
    return
  }
  func.func @transform_0(%arg0: i32) -> (i32, i32) {
    %c0_i32 = arith.constant 0 : i32
    %c0_i32_0 = arith.constant 0 : i32
    return %arg0, %c0_i32 : i32, i32
  }
  func.func @transform_1(%arg0: i32) -> (i32, i32) {
    %c0_i32 = arith.constant 0 : i32
    %c0_i32_0 = arith.constant 0 : i32
    %c0_i32_1 = arith.constant 0 : i32
    return %c0_i32, %c0_i32_0 : i32, i32
  }
  func.func @transform_2(%arg0: i32) -> (i32, i32) {
    %c0_i32 = arith.constant 0 : i32
    %c0_i32_0 = arith.constant 0 : i32
    %c0_i32_1 = arith.constant 0 : i32
    return %c0_i32, %c0_i32_0 : i32, i32
  }
  func.func @transform_3(%arg0: i32) -> (i32, i32) {
    %c0_i32 = arith.constant 0 : i32
    %c0_i32_0 = arith.constant 0 : i32
    %c0_i32_1 = arith.constant 0 : i32
    return %c0_i32, %c0_i32_0 : i32, i32
  }
  func.func @transform_4(%arg0: i32) -> (i32, i32) {
    %c0_i32 = arith.constant 0 : i32
    %c0_i32_0 = arith.constant 0 : i32
    %c0_i32_1 = arith.constant 0 : i32
    return %c0_i32, %c0_i32_0 : i32, i32
  }
  func.func @transform_5(%arg0: i32) -> (i32, i32) {
    %c0_i32 = arith.constant 0 : i32
    %c0_i32_0 = arith.constant 0 : i32
    %c0_i32_1 = arith.constant 0 : i32
    return %c0_i32, %c0_i32_0 : i32, i32
  }
  func.func @transform_6(%arg0: i32) -> (i32, i32) {
    %c0_i32 = arith.constant 0 : i32
    %c0_i32_0 = arith.constant 0 : i32
    %c0_i32_1 = arith.constant 0 : i32
    return %c0_i32, %c0_i32_0 : i32, i32
  }
  func.func @transform_7(%arg0: i32) -> (i32, i32) {
    %c0_i32 = arith.constant 0 : i32
    %c0_i32_0 = arith.constant 0 : i32
    %c0_i32_1 = arith.constant 0 : i32
    return %c0_i32, %c0_i32_0 : i32, i32
  }
  func.func @transform_8(%arg0: i32) -> (i32, i32) {
    %c0_i32 = arith.constant 0 : i32
    %c0_i32_0 = arith.constant 0 : i32
    %c0_i32_1 = arith.constant 0 : i32
    return %c0_i32, %c0_i32_0 : i32, i32
  }
  func.func @transform_9(%arg0: i32) -> (i32, i32) {
    %c0_i32 = arith.constant 0 : i32
    %c0_i32_0 = arith.constant 0 : i32
    %c0_i32_1 = arith.constant 0 : i32
    return %c0_i32, %c0_i32_0 : i32, i32
  }
}

</mosaic_0001>

<bundles_post_ra>
// kernel: lstm_model_forward.1
= control target key start
LH: loop header
LB: loop body
LE: loop exit
PB: predicated region body
PF: predicated region fallthrough
CT: control target
= control target key end

     0   :  { %14 = vsyncpa [#allocation5], 0  ;;  %s3178_s0 = inlined_call_operand.vmem [shape: f32[16,16], index: 0, kind: input, shape index: {}]   ;;  %s3179_s1 = inlined_call_operand.hbm [shape: f32[16,128], index: 1, kind: input, shape index: {}]   ;;  %s3180_s2 = inlined_call_operand.vmem [shape: f32[32,128], index: 2, kind: input, shape index: {}]   ;;  %s3181_s3 = inlined_call_operand.vmem [shape: f32[1,128], index: 3, kind: input, shape index: {}]   ;;  %s3182_s4 = inlined_call_operand.vmem [shape: f32[32,128], index: 4, kind: input, shape index: {}]   ;;  %s3183_s5 = inlined_call_operand.vmem [shape: f32[32,128], index: 5, kind: input, shape index: {}]   ;;  %s3184_s6 = inlined_call_operand.vmem [shape: f32[1,128], index: 6, kind: input, shape index: {}]   ;;  %s3185_s7 = inlined_call_operand.vmem [shape: f32[32,4], index: 7, kind: input, shape index: {}]   ;;  %s3186_s8 = inlined_call_operand.hbm [shape: f32[1,4], index: 8, kind: input, shape index: {}]   ;;  %s3187_s9 = inlined_call_operand.hbm [shape: f32[2,4], index: 9, kind: output, shape index: {}]  }
   0x1   :  { %15 = vsyncpa [#allocation8], 0 }
   0x2   :  { %16 = vsyncpa [#allocation6], 0  ;;  %s2766_s30 = smov [#allocation4]   ;;  %s2694_s13 = scalar_lea.hbm %s3179_s1, 256 }
   0x3   :  { %s24_s10 = sshll.u32 %s2766_s30, 4  ;;  %p2695_p0 = scmp.ne.s32.totalorder %s3179_s1, %s2694_s13  ;;  %s25_s10 = int_to_ptr.vmem [resolvable:$true] %s24_s10 }
   0x4   :  { %p2698_p1 = scmp.lt.u32.totalorder %s2694_s13, %s3179_s1 }
   0x6   :  { %p2700_p2 = pnand %p2698_p1, %p2695_p0 }
   0x8   :  { %2703 = shalt.err (!%p2700_p2)
}
   0x9   :  { %s2704_s18 = scalar_lea.vmem %s25_s10, 256  ;;  %p2709_p4 = scmp.lt.s32.totalorder %s25_s10, %s25_s10 }
   0xa   :  { %p2705_p3 = scmp.ne.s32.totalorder %s25_s10, %s2704_s18  ;;  %p2710_p5 = scmp.lt.s32.totalorder %s2704_s18, %s2704_s18 }
   0xc   :  { %p2711_p6 = por %p2710_p5, %p2709_p4 }
   0xe   :  { %p2712_p7 = pnand %p2711_p6, %p2705_p3 }
  0x10   :  { %2715 = shalt.err (!%p2712_p7)
}
  0x11   :  { %s2767_s19 = smov 128   ;;  %s2768_s20 = smov 8  }
  0x12   :  { %30 = dma.hbm_to_vmem [thread:$0]  %s3179_s1, 256, %s25_s10, [#allocation5], %s2767_s19, %s2767_s19, %s2768_s20  }
  0x13   :  { %s2769_s23 = smov [#allocation7]   ;;  %s2716_s27 = scalar_lea.hbm %s3186_s8, 16 }
  0x14   :  { %s49_s24 = sshll.u32 %s2769_s23, 4  ;;  %p2717_p8 = scmp.ne.s32.totalorder %s3186_s8, %s2716_s27  ;;  %s50_s24 = int_to_ptr.vmem [resolvable:$true] %s49_s24 }
  0x15   :  { %p2720_p9 = scmp.lt.u32.totalorder %s2716_s27, %s3186_s8 }
  0x17   :  { %p2722_p10 = pnand %p2720_p9, %p2717_p8 }
  0x19   :  { %2725 = shalt.err (!%p2722_p10)
}
  0x1a   :  { %s2726_s12 = scalar_lea.vmem %s50_s24, 16  ;;  %s2730_s1 = scalar_lea.vmem %s50_s24, 32 }
  0x1b   :  { %p2727_p11 = scmp.ne.s32.totalorder %s50_s24, %s2726_s12  ;;  %p2731_p12 = scmp.lt.s32.totalorder %s50_s24, %s50_s24 }
  0x1c   :  { %p2732_p13 = scmp.lt.s32.totalorder %s2730_s1, %s2726_s12 }
  0x1e   :  { %p2733_p0 = por %p2732_p13, %p2731_p12 }
  0x20   :  { %p2734_p1 = pnand %p2733_p0, %p2727_p11 }
  0x22   :  { %2737 = shalt.err (!%p2734_p1)
}
  0x23   :  { %52 = dma.hbm_to_vmem [thread:$0]  %s3186_s8, 16, %s50_s24, [#allocation8]  }
  0x24   :  { %2760 = dma.done.wait [#allocation5], 256  }
  0x25   :  { %2761 = vsyncadd [#allocation5], 4294967040 }
  0x26   :  { %2762 = dma.done.wait [#allocation8], 16  }
  0x27   :  { %2763 = vsyncadd [#allocation8], 4294967280  ;;  %v2770_v0 = vmov 0.0|0.0   ;;  %vm2771_vm0 = vmmov 0   ;;  %v2772_v1 = vmov 0.0   ;;  %vm63_vm1 = vcmask 254976  }
  0x28   :  { %2445 = vmatprep.subr.bf16.mxu1 %v2770_v0  ;;  %2251 = vmatprep.mubr.msk.f32.mxu1 %vm2771_vm0, %v2772_v1  ;;  %64 = vst.msk [vmem:[#allocation2] sm:$0x3] %vm63_vm1, %v2772_v1  ;;  %65 = vst.msk [vmem:[#allocation2 + $0x2] sm:$0x3] %vm63_vm1, %v2772_v1  ;;  %vm83_vm2 = vcmask 130048   ;;  %v70_v2 = vld [vmem:[#allocation4] sm:$0xff] }
  0x29   :  { %66 = vst.msk [vmem:[#allocation3] sm:$0x3] %vm63_vm1, %v2772_v1  ;;  %67 = vst.msk [vmem:[#allocation3 + $0x2] sm:$0x3] %vm63_vm1, %v2772_v1  ;;  %v71_v3 = vld [vmem:[#allocation4 + $0x8] sm:$0xff]  ;;  %v72_v4 = vld [vmem:[%s3180_s2] sm:$0xff] }
  0x2a   :  { %v2441_v5 = vpack.c.bf16 %v71_v3, %v70_v2  ;;  %v73_v6 = vld [vmem:[%s3180_s2 + $0x8] sm:$0xff]  ;;  %v68_v7 = vld [vmem:[%s3178_s0] sm:$0xff]  ;;  %v74_v9 = vld [vmem:[%s3180_s2 + $0x10] sm:$0xff]  ;;  %vm167_vm3 = vcmask 261120   ;;  %s2773_s25 = smov 64   ;;  %s2774_s26 = smov 32  }
  0x2b   :  { %v2867_v8 = vpack.c.bf16 %v73_v6, %v72_v4  ;;  %2240 = vmatprep.mubr.msk.f32.mxu0 %vm83_vm2, %v68_v7  ;;  %v75_v10 = vld [vmem:[%s3180_s2 + $0x18] sm:$0xff]  ;;  %v69_v11 = vld [vmem:[%s3178_s0 + $0x8] sm:$0xff]  ;;  %v2101_v14 = vld [vmem:[%s3181_s3] ss:$0 sm:$0xff]  ;;  %vm1025_vm4 = vcmask 1041408   ;;  %vm1027_vm5 = vcmask 1043456  }
  0x2c   :  { %2442 = vmatprep.subr.bf16.mxu0 %v2441_v5  ;;  %v2880_v12 = vpack.c.bf16 %v75_v10, %v74_v9  ;;  %vm1029_vm6 = vcmask 1045504   ;;  %vm1018_vm7 = vcmask 261126   ;;  %s2776_s2 = smov [#allocation9]   ;;  %vm2083_vm8 = vcmask 25600  }
  0x2d   :  { %2447 = vmatpush3.bf16.msra.mxu1 %v2867_v8  ;;  %2444 = vmatpush3.bf16.msra.mxu0 %v2441_v5 }
  0x2e   :  { %2448 = vmatprep.subr.bf16.mxu1 %v2770_v0  ;;  %2451 = vmatprep.subr.bf16.mxu0 %v2770_v0 }
  0x2f   :  { %v165_v13 = vld [vmem:[#allocation2] sm:$0x3] }
  0x30   :  { %2241 = vmatmul.mubr.msk.f32.vlgmr.msra.gmra.mrb[0].mxu0 %vm83_vm2, %v69_v11  ;;  %v166_v23 = vld [vmem:[#allocation3] sm:$0x3] }
  0x31   :  { %2450 = vmatpush3.bf16.msra.mxu1 %v2880_v12  ;;  %2453 = vmatpush3.bf16.msra.mxu0 %v2867_v8 }
  0x32   :  { %2454 = vmatprep.subr.bf16.mxu0 %v2770_v0  ;;  %2262 = vmatprep.mubr.msk.f32.mxu0 %vm2771_vm0, %v2772_v1 }
  0x33   :  { %2457 = vmatprep.subr.bf16.mxu1 %v2770_v0 }
  0x34   :  { %2252 = vmatmul.mubr.msk.f32.vlgmr.msra.gmra.mrb[0].mxu1 %vm167_vm3, %v165_v13 }
  0x35   :  { %2456 = vmatpush3.bf16.msra.mxu0 %v2880_v12  ;;  %2459 = vmatpush3.bf16.msra.mxu1 %v2867_v8 }
  0x36   :  { %2460 = vmatprep.subr.bf16.mxu1 %v2770_v0  ;;  %2273 = vmatprep.mubr.msk.f32.mxu1 %vm2771_vm0, %v2772_v1 }
  0x37   :  { %2463 = vmatprep.subr.bf16.mxu0 %v2770_v0 }
  0x39   :  { %2462 = vmatpush3.bf16.msra.mxu1 %v2880_v12 }
  0x3a   :  { %2469 = vmatprep.subr.bf16.mxu1 %v2770_v0 }
 0x103   :  { %v2242_v15 = vpop.f32.mrb[0].mxu0 }
 0x104   :  { %v2903_v16 = vadd.f32 %v2242_v15, %v2101_v14  ;;  %v156_v17 = vpop.f32.mrb[1].mxu0 }
 0x105   :  { %v2905_v18 = vadd.f32 %v2101_v14, %v156_v17 }
 0x107   :  { %v237_v19 = vpop.f32.mrb[0].mxu1 }
 0x108   :  { %v241_v20 = vadd.f32 %v237_v19, %v2905_v18  ;;  %v2253_v21 = vpop.f32.mrb[1].mxu1 }
 0x10a   :  { %2566 = vtanh.f32 %v241_v20  ;;  %v2105_v24 = vmul.f32 -1.442695, %v241_v20 }
 0x10c   :  { %2568 = vpow2.f32 %v2105_v24 }
 0x114   :  { %v2567_v22 = vpop.eup %2566 }
 0x115   :  { %255 = vrot.lane.b32.xlu0 %v2567_v22, %s2773_s25 }
 0x116   :  { %v2569_v25 = vpop.eup %2568 }
 0x117   :  { %v245_v26 = vadd.f32 1.0, %v2569_v25 }
 0x119   :  { %250 = vrot.lane.b32.xlu0 %v166_v23, %s2774_s26  ;;  %2570 = vrcp.f32 %v245_v26 }
 0x123   :  { %v2571_v27 = vpop.eup %2570 }
 0x187   :  { %v256_v28 = vpop.permute.xlu0 %255 }
 0x188   :  { %v258_v29 = vmul.f32 %v2571_v27, %v256_v28 }
 0x18a   :  { %260 = vrot.lane.b32.xlu1 %v258_v29, %s2774_s26 }
 0x18b   :  { %v251_v30 = vpop.permute.xlu0 %250 }
 0x18c   :  { %v253_v31 = vmul.f32 %v2571_v27, %v251_v30 }
 0x1fc   :  { %v261_v32 = vpop.permute.xlu1 %260 }
 0x1fd   :  { %v263_v33 = vadd.f32 %v261_v32, %v253_v31 }
 0x1ff   :  { %2572 = vtanh.f32 %v263_v33  ;;  %v357_v49 = vrot.slane %v263_v33, 6 }
 0x209   :  { %v2573_v34 = vpop.eup %2572 }
 0x20a   :  { %266 = vrot.lane.b32.xlu1 %v2573_v34, %s2773_s25 }
 0x27c   :  { %v267_v35 = vpop.permute.xlu1 %266 }
 0x27d   :  { %v2912_v36 = vmul.f32 %v2571_v27, %v267_v35 }
 0x27f   :  { %271 = vrot.lane.b32.xlu0 %v2912_v36, %s2774_s26 }
 0x2f1   :  { %v272_v37 = vpop.permute.xlu0 %271 }
 0x2f2   :  { %2263 = vmatmul.mubr.msk.f32.vlgmr.msra.gmra.mrb[2].mxu0 %vm167_vm3, %v272_v37 }
 0x2f3   :  { %2465 = vmatpush3.bf16.msra.mxu0 %v2867_v8  ;;  %2284 = vmatprep.mubr.msk.f32.mxu0 %vm2771_vm0, %v2772_v1 }
 0x2f4   :  { %2466 = vmatprep.subr.bf16.mxu0 %v2770_v0 }
 0x2f7   :  { %2468 = vmatpush3.bf16.msra.mxu0 %v2880_v12 }
 0x2f8   :  { %2475 = vmatprep.subr.bf16.mxu0 %v2770_v0 }
 0x3c5   :  { %v341_v38 = vpop.f32.mrb[2].mxu0 }
 0x3c6   :  { %v346_v39 = vrot.slane %v341_v38, 6  ;;  %v2264_v40 = vpop.f32.mrb[3].mxu0 }
 0x3c8   :  { %v348_v41 = vadd.f32 %v346_v39, %v2905_v18 }
 0x3ca   :  { %2574 = vtanh.f32 %v348_v41  ;;  %v2107_v43 = vmul.f32 -1.442695, %v348_v41 }
 0x3cc   :  { %2576 = vpow2.f32 %v2107_v43 }
 0x3d4   :  { %v2575_v42 = vpop.eup %2574 }
 0x3d5   :  { %361 = vrot.lane.b32.xlu1 %v2575_v42, %s2773_s25 }
 0x3d6   :  { %v2577_v44 = vpop.eup %2576 }
 0x3d7   :  { %v352_v45 = vadd.f32 1.0, %v2577_v44 }
 0x3d9   :  { %2578 = vrcp.f32 %v352_v45 }
 0x3e3   :  { %v2579_v46 = vpop.eup %2578 }
 0x3e4   :  { %v359_v50 = vmul.f32 %v2579_v46, %v357_v49 }
 0x447   :  { %v362_v47 = vpop.permute.xlu1 %361 }
 0x448   :  { %v364_v48 = vmul.f32 %v2579_v46, %v362_v47 }
 0x44a   :  { %366 = vrot.lane.b32.xlu0 %v364_v48, %s2774_s26 }
 0x4bc   :  { %v367_v51 = vpop.permute.xlu0 %366 }
 0x4bd   :  { %v369_v52 = vadd.f32 %v367_v51, %v359_v50 }
 0x4bf   :  { %2580 = vtanh.f32 %v369_v52  ;;  %v464_v7 = vrot.slane %v369_v52, 6 }
 0x4c9   :  { %v2581_v53 = vpop.eup %2580 }
 0x4ca   :  { %372 = vrot.lane.b32.xlu1 %v2581_v53, %s2773_s25 }
 0x53c   :  { %v373_v54 = vpop.permute.xlu1 %372 }
 0x53d   :  { %v375_v55 = vmul.f32 %v2579_v46, %v373_v54 }
 0x53f   :  { %v377_v56 = vrot.slane %v375_v55, 2  ;;  %v1026_v17 = vsel %vm1025_vm4, %v2912_v36, %v375_v55 }
 0x541   :  { %378 = vrot.lane.b32.xlu0 %v377_v56, %s2774_s26 }
 0x5b3   :  { %v379_v57 = vpop.permute.xlu0 %378 }
 0x5b4   :  { %2274 = vmatmul.mubr.msk.f32.vlgmr.msra.gmra.mrb[2].mxu1 %vm167_vm3, %v379_v57 }
 0x5b5   :  { %2471 = vmatpush3.bf16.msra.mxu1 %v2867_v8  ;;  %2295 = vmatprep.mubr.msk.f32.mxu1 %vm2771_vm0, %v2772_v1 }
 0x5b6   :  { %2472 = vmatprep.subr.bf16.mxu1 %v2770_v0 }
 0x5b9   :  { %2474 = vmatpush3.bf16.msra.mxu1 %v2880_v12 }
 0x5ba   :  { %2481 = vmatprep.subr.bf16.mxu1 %v2770_v0 }
 0x687   :  { %v448_v58 = vpop.f32.mrb[2].mxu1 }
 0x688   :  { %v453_v59 = vrot.slane %v448_v58, 4  ;;  %v2275_v60 = vpop.f32.mrb[3].mxu1 }
 0x68a   :  { %v455_v61 = vadd.f32 %v453_v59, %v2905_v18 }
 0x68c   :  { %2582 = vtanh.f32 %v455_v61  ;;  %v2109_v63 = vmul.f32 -1.442695, %v455_v61 }
 0x68e   :  { %2584 = vpow2.f32 %v2109_v63 }
 0x696   :  { %v2583_v62 = vpop.eup %2582 }
 0x697   :  { %468 = vrot.lane.b32.xlu1 %v2583_v62, %s2773_s25 }
 0x698   :  { %v2585_v2 = vpop.eup %2584 }
 0x699   :  { %v459_v3 = vadd.f32 1.0, %v2585_v2 }
 0x69b   :  { %2586 = vrcp.f32 %v459_v3 }
 0x6a5   :  { %v2587_v4 = vpop.eup %2586 }
 0x6a6   :  { %v466_v9 = vmul.f32 %v2587_v4, %v464_v7 }
 0x709   :  { %v469_v5 = vpop.permute.xlu1 %468 }
 0x70a   :  { %v471_v6 = vmul.f32 %v2587_v4, %v469_v5 }
 0x70c   :  { %473 = vrot.lane.b32.xlu0 %v471_v6, %s2774_s26 }
 0x77e   :  { %v474_v10 = vpop.permute.xlu0 %473 }
 0x77f   :  { %v476_v11 = vadd.f32 %v474_v10, %v466_v9 }
 0x781   :  { %2588 = vtanh.f32 %v476_v11  ;;  %v571_v33 = vrot.slane %v476_v11, 6 }
 0x78b   :  { %v2589_v13 = vpop.eup %2588 }
 0x78c   :  { %479 = vrot.lane.b32.xlu1 %v2589_v13, %s2773_s25 }
 0x7fe   :  { %v480_v14 = vpop.permute.xlu1 %479 }
 0x7ff   :  { %v482_v15 = vmul.f32 %v2587_v4, %v480_v14 }
 0x801   :  { %v484_v19 = vrot.slane %v482_v15, 4  ;;  %v1028_v20 = vsel %vm1027_vm5, %v1026_v17, %v482_v15 }
 0x803   :  { %485 = vrot.lane.b32.xlu0 %v484_v19, %s2774_s26 }
 0x875   :  { %v486_v21 = vpop.permute.xlu0 %485 }
 0x876   :  { %2285 = vmatmul.mubr.msk.f32.vlgmr.msra.gmra.mrb[4].mxu0 %vm167_vm3, %v486_v21 }
 0x877   :  { %2477 = vmatpush3.bf16.msra.mxu0 %v2867_v8  ;;  %2306 = vmatprep.mubr.msk.f32.mxu0 %vm2771_vm0, %v2772_v1 }
 0x878   :  { %2478 = vmatprep.subr.bf16.mxu0 %v2770_v0 }
 0x87b   :  { %2480 = vmatpush3.bf16.msra.mxu0 %v2880_v12 }
 0x87c   :  { %2487 = vmatprep.subr.bf16.mxu0 %v2770_v0 }
 0x949   :  { %v555_v22 = vpop.f32.mrb[4].mxu0 }
 0x94a   :  { %v560_v23 = vrot.slane %v555_v22, 2  ;;  %v2286_v24 = vpop.f32.mrb[5].mxu0 }
 0x94c   :  { %v562_v25 = vadd.f32 %v560_v23, %v2905_v18 }
 0x94e   :  { %2590 = vtanh.f32 %v562_v25  ;;  %v2111_v27 = vmul.f32 -1.442695, %v562_v25 }
 0x950   :  { %2592 = vpow2.f32 %v2111_v27 }
 0x958   :  { %v2591_v26 = vpop.eup %2590 }
 0x959   :  { %575 = vrot.lane.b32.xlu1 %v2591_v26, %s2773_s25 }
 0x95a   :  { %v2593_v28 = vpop.eup %2592 }
 0x95b   :  { %v566_v29 = vadd.f32 1.0, %v2593_v28 }
 0x95d   :  { %2594 = vrcp.f32 %v566_v29 }
 0x967   :  { %v2595_v30 = vpop.eup %2594 }
 0x968   :  { %v573_v34 = vmul.f32 %v2595_v30, %v571_v33 }
 0x9cb   :  { %v576_v31 = vpop.permute.xlu1 %575 }
 0x9cc   :  { %v578_v32 = vmul.f32 %v2595_v30, %v576_v31 }
 0x9ce   :  { %580 = vrot.lane.b32.xlu0 %v578_v32, %s2774_s26 }
 0xa40   :  { %v581_v35 = vpop.permute.xlu0 %580 }
 0xa41   :  { %v583_v36 = vadd.f32 %v581_v35, %v573_v34 }
 0xa43   :  { %2596 = vtanh.f32 %v583_v36  ;;  %v675_v52 = vrot.slane %v583_v36, 6 }
 0xa4d   :  { %v2597_v18 = vpop.eup %2596 }
 0xa4e   :  { %586 = vrot.lane.b32.xlu1 %v2597_v18, %s2773_s25 }
 0xac0   :  { %v587_v37 = vpop.permute.xlu1 %586 }
 0xac1   :  { %v589_v38 = vmul.f32 %v2595_v30, %v587_v37 }
 0xac3   :  { %v591_v39 = vrot.slane %v589_v38, 6  ;;  %v2955_v40 = vsel %vm1029_vm6, %v1028_v20, %v589_v38 }
 0xac5   :  { %592 = vrot.lane.b32.xlu0 %v591_v39, %s2774_s26 }
 0xb37   :  { %v593_v41 = vpop.permute.xlu0 %592 }
 0xb38   :  { %2296 = vmatmul.mubr.msk.f32.vlgmr.msra.gmra.mrb[4].mxu1 %vm167_vm3, %v593_v41 }
 0xb39   :  { %2483 = vmatpush3.bf16.msra.mxu1 %v2867_v8  ;;  %2317 = vmatprep.mubr.msk.f32.mxu1 %vm2771_vm0, %v2772_v1 }
 0xb3a   :  { %2484 = vmatprep.subr.bf16.mxu1 %v2770_v0 }
 0xb3d   :  { %2486 = vmatpush3.bf16.msra.mxu1 %v2880_v12 }
 0xc0b   :  { %v662_v42 = vpop.f32.mrb[4].mxu1 }
 0xc0c   :  { %v666_v43 = vadd.f32 %v662_v42, %v2903_v16  ;;  %v2297_v44 = vpop.f32.mrb[5].mxu1 }
 0xc0e   :  { %2598 = vtanh.f32 %v666_v43  ;;  %v2113_v46 = vmul.f32 -1.442695, %v666_v43 }
 0xc10   :  { %2600 = vpow2.f32 %v2113_v46 }
 0xc18   :  { %v2599_v45 = vpop.eup %2598 }
 0xc19   :  { %679 = vrot.lane.b32.xlu1 %v2599_v45, %s2773_s25 }
 0xc1a   :  { %v2601_v47 = vpop.eup %2600 }
 0xc1b   :  { %v670_v48 = vadd.f32 1.0, %v2601_v47 }
 0xc1d   :  { %2602 = vrcp.f32 %v670_v48 }
 0xc27   :  { %v2603_v49 = vpop.eup %2602 }
 0xc28   :  { %v677_v53 = vmul.f32 %v2603_v49, %v675_v52 }
 0xc8b   :  { %v680_v50 = vpop.permute.xlu1 %679 }
 0xc8c   :  { %v682_v51 = vmul.f32 %v2603_v49, %v680_v50 }
 0xc8e   :  { %684 = vrot.lane.b32.xlu0 %v682_v51, %s2774_s26 }
 0xd00   :  { %v685_v54 = vpop.permute.xlu0 %684 }
 0xd01   :  { %v687_v55 = vadd.f32 %v685_v54, %v677_v53 }
 0xd03   :  { %2604 = vtanh.f32 %v687_v55 }
 0xd0d   :  { %v2605_v56 = vpop.eup %2604 }
 0xd0e   :  { %690 = vrot.lane.b32.xlu1 %v2605_v56, %s2773_s25 }
 0xd80   :  { %v691_v57 = vpop.permute.xlu1 %690 }
 0xd81   :  { %v2968_v58 = vmul.f32 %v2603_v49, %v691_v57  ;;  %v1034_v57 = vld [vmem:[%s3182_s4] sm:$0xff] }
 0xd83   :  { %695 = vrot.lane.b32.xlu0 %v2968_v58, %s2774_s26 }
 0xdf5   :  { %v696_v59 = vpop.permute.xlu0 %695 }
 0xdf6   :  { %2307 = vmatmul.mubr.msk.f32.vlgmr.msra.gmra.mrb[6].mxu0 %vm167_vm3, %v696_v59 }
 0xdf7   :  { %2489 = vmatpush3.bf16.msra.mxu0 %v2867_v8  ;;  %2328 = vmatprep.mubr.msk.f32.mxu0 %vm2771_vm0, %v2772_v1 }
 0xdf8   :  { %2490 = vmatprep.subr.bf16.mxu0 %v2770_v0 }
 0xdfb   :  { %2492 = vmatpush3.bf16.msra.mxu0 %v2880_v12  ;;  %v781_v12 = vrot.slane %v687_v55, 6 }
 0xdfc   :  { %2501 = vmatprep.subr.bf16.mxu0 %v2770_v0 }
 0xec9   :  { %v765_v60 = vpop.f32.mrb[6].mxu0 }
 0xeca   :  { %v770_v61 = vrot.slane %v765_v60, 6  ;;  %v2308_v62 = vpop.f32.mrb[7].mxu0  ;;  %v1039_v60 = vld [vmem:[%s3183_s5 + $0x8] sm:$0xff] }
 0xecb   :  { %v1037_v62 = vld [vmem:[%s3182_s4 + $0x18] sm:$0xff] }
 0xecc   :  { %v772_v63 = vadd.f32 %v770_v61, %v2903_v16  ;;  %v1036_v61 = vld [vmem:[%s3182_s4 + $0x10] sm:$0xff] }
 0xece   :  { %2606 = vtanh.f32 %v772_v63  ;;  %v2115_v3 = vmul.f32 -1.442695, %v772_v63 }
 0xed0   :  { %2608 = vpow2.f32 %v2115_v3  ;;  %v1040_v3 = vld [vmem:[%s3183_s5 + $0x10] sm:$0xff] }
 0xed8   :  { %v2607_v2 = vpop.eup %2606 }
 0xed9   :  { %785 = vrot.lane.b32.xlu1 %v2607_v2, %s2773_s25  ;;  %v2497_v2 = vpack.c.bf16 %v1037_v62, %v1036_v61 }
 0xeda   :  { %v2609_v8 = vpop.eup %2608 }
 0xedb   :  { %v776_v4 = vadd.f32 1.0, %v2609_v8  ;;  %v1041_v8 = vld [vmem:[%s3183_s5 + $0x18] sm:$0xff] }
 0xedd   :  { %2610 = vrcp.f32 %v776_v4  ;;  %v3032_v4 = vpack.c.bf16 %v1041_v8, %v1040_v3 }
 0xee7   :  { %v2611_v5 = vpop.eup %2610 }
 0xee8   :  { %v783_v9 = vmul.f32 %v2611_v5, %v781_v12 }
 0xf4b   :  { %v786_v6 = vpop.permute.xlu1 %785 }
 0xf4c   :  { %v788_v7 = vmul.f32 %v2611_v5, %v786_v6  ;;  %v1135_v6 = vld [vmem:[#allocation2 + $0x2] sm:$0x3] }
 0xf4e   :  { %790 = vrot.lane.b32.xlu0 %v788_v7, %s2774_s26 }
 0xfc0   :  { %v791_v10 = vpop.permute.xlu0 %790 }
 0xfc1   :  { %v793_v11 = vadd.f32 %v791_v10, %v783_v9  ;;  %v1137_v10 = vld [vmem:[#allocation3 + $0x2] sm:$0x3] }
 0xfc3   :  { %2612 = vtanh.f32 %v793_v11  ;;  %v888_v31 = vrot.slane %v793_v11, 6 }
 0xfcd   :  { %v2613_v13 = vpop.eup %2612 }
 0xfce   :  { %796 = vrot.lane.b32.xlu1 %v2613_v13, %s2773_s25 }
0x1040   :  { %v797_v14 = vpop.permute.xlu1 %796 }
0x1041   :  { %v799_v15 = vmul.f32 %v2611_v5, %v797_v14 }
0x1043   :  { %v801_v17 = vrot.slane %v799_v15, 2  ;;  %v1031_v37 = vsel %vm1025_vm4, %v2968_v58, %v799_v15  ;;  %v1035_v58 = vld [vmem:[%s3182_s4 + $0x8] sm:$0xff]  ;;  %v2120_v15 = vld [vmem:[%s3184_s6] ss:$0 sm:$0xff] }
0x1044   :  { %v2493_v59 = vpack.c.bf16 %v1035_v58, %v1034_v57 }
0x1045   :  { %802 = vrot.lane.b32.xlu0 %v801_v17, %s2774_s26 }
0x1046   :  { %2494 = vmatprep.subr.bf16.mxu1 %v2493_v59 }
0x10b7   :  { %v803_v19 = vpop.permute.xlu0 %802 }
0x10b8   :  { %2318 = vmatmul.mubr.msk.f32.vlgmr.msra.gmra.mrb[6].mxu1 %vm167_vm3, %v803_v19 }
0x10b9   :  { %2496 = vmatpush3.bf16.msra.mxu1 %v2493_v59 }
0x10ba   :  { %2498 = vmatprep.subr.bf16.mxu1 %v2497_v2 }
0x10bd   :  { %2500 = vmatpush3.bf16.msra.mxu1 %v2497_v2 }
0x10be   :  { %2507 = vmatprep.subr.bf16.mxu1 %v2770_v0 }
0x118b   :  { %v872_v20 = vpop.f32.mrb[6].mxu1 }
0x118c   :  { %v877_v21 = vrot.slane %v872_v20, 4  ;;  %v2319_v22 = vpop.f32.mrb[7].mxu1 }
0x118e   :  { %v879_v23 = vadd.f32 %v877_v21, %v2903_v16 }
0x1190   :  { %2614 = vtanh.f32 %v879_v23  ;;  %v2117_v25 = vmul.f32 -1.442695, %v879_v23 }
0x1192   :  { %2616 = vpow2.f32 %v2117_v25 }
0x119a   :  { %v2615_v24 = vpop.eup %2614 }
0x119b   :  { %892 = vrot.lane.b32.xlu1 %v2615_v24, %s2773_s25 }
0x119c   :  { %v2617_v26 = vpop.eup %2616 }
0x119d   :  { %v883_v27 = vadd.f32 1.0, %v2617_v26 }
0x119f   :  { %2618 = vrcp.f32 %v883_v27 }
0x11a9   :  { %v2619_v28 = vpop.eup %2618 }
0x11aa   :  { %v890_v32 = vmul.f32 %v2619_v28, %v888_v31 }
0x120d   :  { %v893_v29 = vpop.permute.xlu1 %892 }
0x120e   :  { %v895_v30 = vmul.f32 %v2619_v28, %v893_v29 }
0x1210   :  { %897 = vrot.lane.b32.xlu0 %v895_v30, %s2774_s26 }
0x1282   :  { %v898_v33 = vpop.permute.xlu0 %897 }
0x1283   :  { %v900_v34 = vadd.f32 %v898_v33, %v890_v32 }
0x1285   :  { %2620 = vtanh.f32 %v900_v34  ;;  %v995_v53 = vrot.slane %v900_v34, 6 }
0x128f   :  { %v2621_v35 = vpop.eup %2620 }
0x1290   :  { %903 = vrot.lane.b32.xlu1 %v2621_v35, %s2773_s25 }
0x1302   :  { %v904_v36 = vpop.permute.xlu1 %903 }
0x1303   :  { %v906_v18 = vmul.f32 %v2619_v28, %v904_v36 }
0x1305   :  { %v908_v38 = vrot.slane %v906_v18, 4  ;;  %v1032_v39 = vsel %vm1027_vm5, %v1031_v37, %v906_v18 }
0x1307   :  { %909 = vrot.lane.b32.xlu0 %v908_v38, %s2774_s26 }
0x1379   :  { %v910_v41 = vpop.permute.xlu0 %909 }
0x137a   :  { %2329 = vmatmul.mubr.msk.f32.vlgmr.msra.gmra.mrb[8].mxu0 %vm167_vm3, %v910_v41 }
0x137b   :  { %2350 = vmatprep.mubr.msk.f32.mxu0 %vm2771_vm0, %v2772_v1 }
0x144d   :  { %v979_v42 = vpop.f32.mrb[8].mxu0 }
0x144e   :  { %v984_v43 = vrot.slane %v979_v42, 2  ;;  %v2330_v44 = vpop.f32.mrb[9].mxu0 }
0x1450   :  { %v986_v45 = vadd.f32 %v984_v43, %v2903_v16 }
0x1452   :  { %2622 = vtanh.f32 %v986_v45  ;;  %v2119_v47 = vmul.f32 -1.442695, %v986_v45 }
0x1454   :  { %2624 = vpow2.f32 %v2119_v47 }
0x145c   :  { %v2623_v46 = vpop.eup %2622 }
0x145d   :  { %999 = vrot.lane.b32.xlu1 %v2623_v46, %s2773_s25 }
0x145e   :  { %v2625_v48 = vpop.eup %2624 }
0x145f   :  { %v990_v49 = vadd.f32 1.0, %v2625_v48 }
0x1461   :  { %2626 = vrcp.f32 %v990_v49 }
0x146b   :  { %v2627_v50 = vpop.eup %2626 }
0x146c   :  { %v997_v54 = vmul.f32 %v2627_v50, %v995_v53 }
0x14cf   :  { %v1000_v51 = vpop.permute.xlu1 %999 }
0x14d0   :  { %v1002_v52 = vmul.f32 %v2627_v50, %v1000_v51 }
0x14d2   :  { %1004 = vrot.lane.b32.xlu0 %v1002_v52, %s2774_s26 }
0x14d6   :  { %1051 = vrot.lane.b32.xlu0 %v2955_v40, %s2774_s26  ;;  %v1038_v40 = vld [vmem:[%s3183_s5] sm:$0xff] }
0x14d7   :  { %v3023_v63 = vpack.c.bf16 %v1039_v60, %v1038_v40 }
0x14d9   :  { %2503 = vmatpush3.bf16.msra.mxu0 %v3023_v63 }
0x14da   :  { %2504 = vmatprep.subr.bf16.mxu0 %v2770_v0 }
0x14dd   :  { %2506 = vmatpush3.bf16.msra.mxu0 %v3032_v4 }
0x14de   :  { %2513 = vmatprep.subr.bf16.mxu0 %v2770_v0 }
0x14e0   :  { %2351 = vmatmul.mubr.msk.f32.vlgmr.msra.gmra.mrb[10].mxu0 %vm167_vm3, %v1135_v6 }
0x14e1   :  { %2515 = vmatpush3.bf16.msra.mxu0 %v3023_v63  ;;  %2372 = vmatprep.mubr.msk.f32.mxu0 %vm2771_vm0, %v2772_v1 }
0x14e2   :  { %2516 = vmatprep.subr.bf16.mxu0 %v2770_v0 }
0x14e5   :  { %2518 = vmatpush3.bf16.msra.mxu0 %v3032_v4 }
0x14e6   :  { %2525 = vmatprep.subr.bf16.mxu0 %v2770_v0 }
0x1544   :  { %v1005_v16 = vpop.permute.xlu0 %1004 }
0x1545   :  { %v3001_v55 = vadd.f32 %v1005_v16, %v997_v54 }
0x1547   :  { %2628 = vtanh.f32 %v3001_v55 }
0x1548   :  { %v1052_v56 = vpop.permute.xlu0 %1051 }
0x1549   :  { %2339 = vmatprep.mubr.msk.f32.mxu1 %vm167_vm3, %v1052_v56 }
0x1551   :  { %v2629_v5 = vpop.eup %2628 }
0x1552   :  { %1010 = vrot.lane.b32.xlu1 %v2629_v5, %s2773_s25 }
0x15b3   :  { %v1207_v13 = vpop.f32.mrb[10].mxu0 }
0x15b4   :  { %v2352_v14 = vpop.f32.mrb[11].mxu0 }
0x15c4   :  { %v1011_v7 = vpop.permute.xlu1 %1010 }
0x15c5   :  { %v3046_v12 = vmul.f32 %v2627_v50, %v1011_v7 }
0x15c7   :  { %v1033_v9 = vsel %vm1029_vm6, %v1032_v39, %v3046_v12 }
0x15c8   :  { %1053 = vrot.lane.b32.xlu1 %v1033_v9, %s2774_s26 }
0x15cc   :  { %1220 = vrot.lane.b32.xlu1 %v1137_v10, %s2774_s26 }
0x163a   :  { %v1054_v11 = vpop.permute.xlu1 %1053 }
0x163b   :  { %2340 = vmatmul.mubr.msk.f32.vlgmr.msra.gmra.mrb[8].mxu1 %vm167_vm3, %v1054_v11 }
0x163c   :  { %2509 = vmatpush3.bf16.msra.mxu1 %v3023_v63  ;;  %2361 = vmatprep.mubr.msk.f32.mxu1 %vm2771_vm0, %v2772_v1 }
0x163d   :  { %2510 = vmatprep.subr.bf16.mxu1 %v2770_v0 }
0x163e   :  { %v1221_v30 = vpop.permute.xlu1 %1220 }
0x1640   :  { %2512 = vmatpush3.bf16.msra.mxu1 %v3032_v4 }
0x1641   :  { %2519 = vmatprep.subr.bf16.mxu1 %v2770_v0 }
0x170e   :  { %v2341_v17 = vpop.f32.mrb[8].mxu1 }
0x170f   :  { %v3062_v19 = vadd.f32 %v2341_v17, %v2120_v15  ;;  %v1125_v20 = vpop.f32.mrb[9].mxu1 }
0x1710   :  { %v3064_v21 = vadd.f32 %v2120_v15, %v1125_v20 }
0x1712   :  { %v1211_v22 = vadd.f32 %v1207_v13, %v3064_v21 }
0x1714   :  { %2630 = vtanh.f32 %v1211_v22  ;;  %v2124_v24 = vmul.f32 -1.442695, %v1211_v22 }
0x1716   :  { %2632 = vpow2.f32 %v2124_v24 }
0x171e   :  { %v2631_v23 = vpop.eup %2630 }
0x171f   :  { %1225 = vrot.lane.b32.xlu0 %v2631_v23, %s2773_s25 }
0x1720   :  { %v2633_v25 = vpop.eup %2632 }
0x1721   :  { %v1215_v26 = vadd.f32 1.0, %v2633_v25 }
0x1723   :  { %2634 = vrcp.f32 %v1215_v26 }
0x172d   :  { %v2635_v27 = vpop.eup %2634 }
0x172e   :  { %v1223_v31 = vmul.f32 %v2635_v27, %v1221_v30 }
0x1791   :  { %v1226_v28 = vpop.permute.xlu0 %1225 }
0x1792   :  { %v1228_v29 = vmul.f32 %v2635_v27, %v1226_v28 }
0x1794   :  { %1230 = vrot.lane.b32.xlu0 %v1228_v29, %s2774_s26 }
0x1806   :  { %v1231_v32 = vpop.permute.xlu0 %1230 }
0x1807   :  { %v1233_v33 = vadd.f32 %v1231_v32, %v1223_v31 }
0x1809   :  { %2636 = vtanh.f32 %v1233_v33  ;;  %v1327_v49 = vrot.slane %v1233_v33, 6 }
0x1813   :  { %v2637_v34 = vpop.eup %2636 }
0x1814   :  { %1236 = vrot.lane.b32.xlu1 %v2637_v34, %s2773_s25 }
0x1886   :  { %v1237_v35 = vpop.permute.xlu1 %1236 }
0x1887   :  { %v1239_v36 = vmul.f32 %v2635_v27, %v1237_v35 }
0x1889   :  { %1241 = vrot.lane.b32.xlu0 %v1239_v36, %s2774_s26 }
0x18fb   :  { %v1242_v18 = vpop.permute.xlu0 %1241 }
0x18fc   :  { %2362 = vmatmul.mubr.msk.f32.vlgmr.msra.gmra.mrb[10].mxu1 %vm167_vm3, %v1242_v18 }
0x18fd   :  { %2521 = vmatpush3.bf16.msra.mxu1 %v3023_v63  ;;  %2383 = vmatprep.mubr.msk.f32.mxu1 %vm2771_vm0, %v2772_v1 }
0x18fe   :  { %2522 = vmatprep.subr.bf16.mxu1 %v2770_v0 }
0x1901   :  { %2524 = vmatpush3.bf16.msra.mxu1 %v3032_v4 }
0x1902   :  { %2531 = vmatprep.subr.bf16.mxu1 %v2770_v0 }
0x19cf   :  { %v1311_v37 = vpop.f32.mrb[10].mxu1 }
0x19d0   :  { %v1316_v38 = vrot.slane %v1311_v37, 6  ;;  %v2363_v39 = vpop.f32.mrb[11].mxu1 }
0x19d2   :  { %v1318_v41 = vadd.f32 %v1316_v38, %v3064_v21 }
0x19d4   :  { %2638 = vtanh.f32 %v1318_v41  ;;  %v2126_v43 = vmul.f32 -1.442695, %v1318_v41 }
0x19d6   :  { %2640 = vpow2.f32 %v2126_v43 }
0x19de   :  { %v2639_v42 = vpop.eup %2638 }
0x19df   :  { %1331 = vrot.lane.b32.xlu1 %v2639_v42, %s2773_s25 }
0x19e0   :  { %v2641_v44 = vpop.eup %2640 }
0x19e1   :  { %v1322_v45 = vadd.f32 1.0, %v2641_v44 }
0x19e3   :  { %2642 = vrcp.f32 %v1322_v45 }
0x19ed   :  { %v2643_v46 = vpop.eup %2642 }
0x19ee   :  { %v1329_v50 = vmul.f32 %v2643_v46, %v1327_v49 }
0x1a51   :  { %v1332_v47 = vpop.permute.xlu1 %1331 }
0x1a52   :  { %v1334_v48 = vmul.f32 %v2643_v46, %v1332_v47 }
0x1a54   :  { %1336 = vrot.lane.b32.xlu0 %v1334_v48, %s2774_s26 }
0x1ac6   :  { %v1337_v51 = vpop.permute.xlu0 %1336 }
0x1ac7   :  { %v1339_v52 = vadd.f32 %v1337_v51, %v1329_v50 }
0x1ac9   :  { %2644 = vtanh.f32 %v1339_v52  ;;  %v1434_v7 = vrot.slane %v1339_v52, 6 }
0x1ad3   :  { %v2645_v53 = vpop.eup %2644 }
0x1ad4   :  { %1342 = vrot.lane.b32.xlu1 %v2645_v53, %s2773_s25 }
0x1b46   :  { %v1343_v54 = vpop.permute.xlu1 %1342 }
0x1b47   :  { %v1345_v16 = vmul.f32 %v2643_v46, %v1343_v54 }
0x1b49   :  { %v1347_v56 = vrot.slane %v1345_v16, 2 }
0x1b4b   :  { %1348 = vrot.lane.b32.xlu0 %v1347_v56, %s2774_s26 }
0x1bbd   :  { %v1349_v57 = vpop.permute.xlu0 %1348 }
0x1bbe   :  { %2373 = vmatmul.mubr.msk.f32.vlgmr.msra.gmra.mrb[12].mxu0 %vm167_vm3, %v1349_v57 }
0x1bbf   :  { %2527 = vmatpush3.bf16.msra.mxu0 %v3023_v63  ;;  %2394 = vmatprep.mubr.msk.f32.mxu0 %vm2771_vm0, %v2772_v1 }
0x1bc0   :  { %2528 = vmatprep.subr.bf16.mxu0 %v2770_v0 }
0x1bc3   :  { %2530 = vmatpush3.bf16.msra.mxu0 %v3032_v4 }
0x1bc4   :  { %2537 = vmatprep.subr.bf16.mxu0 %v2770_v0 }
0x1c91   :  { %v1418_v58 = vpop.f32.mrb[12].mxu0 }
0x1c92   :  { %v1423_v40 = vrot.slane %v1418_v58, 4  ;;  %v2374_v59 = vpop.f32.mrb[13].mxu0 }
0x1c94   :  { %v1425_v60 = vadd.f32 %v1423_v40, %v3064_v21 }
0x1c96   :  { %2646 = vtanh.f32 %v1425_v60  ;;  %v2128_v62 = vmul.f32 -1.442695, %v1425_v60 }
0x1c98   :  { %2648 = vpow2.f32 %v2128_v62 }
0x1ca0   :  { %v2647_v61 = vpop.eup %2646 }
0x1ca1   :  { %1438 = vrot.lane.b32.xlu1 %v2647_v61, %s2773_s25 }
0x1ca2   :  { %v2649_v2 = vpop.eup %2648 }
0x1ca3   :  { %v1429_v3 = vadd.f32 1.0, %v2649_v2 }
0x1ca5   :  { %2650 = vrcp.f32 %v1429_v3 }
0x1caf   :  { %v2651_v8 = vpop.eup %2650 }
0x1cb0   :  { %v1436_v9 = vmul.f32 %v2651_v8, %v1434_v7 }
0x1d13   :  { %v1439_v5 = vpop.permute.xlu1 %1438 }
0x1d14   :  { %v1441_v6 = vmul.f32 %v2651_v8, %v1439_v5 }
0x1d16   :  { %1443 = vrot.lane.b32.xlu0 %v1441_v6, %s2774_s26 }
0x1d88   :  { %v1444_v10 = vpop.permute.xlu0 %1443 }
0x1d89   :  { %v1446_v11 = vadd.f32 %v1444_v10, %v1436_v9 }
0x1d8b   :  { %2652 = vtanh.f32 %v1446_v11  ;;  %v1541_v33 = vrot.slane %v1446_v11, 6 }
0x1d95   :  { %v2653_v13 = vpop.eup %2652 }
0x1d96   :  { %1449 = vrot.lane.b32.xlu1 %v2653_v13, %s2773_s25 }
0x1e08   :  { %v1450_v14 = vpop.permute.xlu1 %1449 }
0x1e09   :  { %v1452_v15 = vmul.f32 %v2651_v8, %v1450_v14 }
0x1e0b   :  { %v1454_v17 = vrot.slane %v1452_v15, 4 }
0x1e0d   :  { %1455 = vrot.lane.b32.xlu0 %v1454_v17, %s2774_s26 }
0x1e7f   :  { %v1456_v20 = vpop.permute.xlu0 %1455 }
0x1e80   :  { %2384 = vmatmul.mubr.msk.f32.vlgmr.msra.gmra.mrb[12].mxu1 %vm167_vm3, %v1456_v20 }
0x1e81   :  { %2533 = vmatpush3.bf16.msra.mxu1 %v3023_v63  ;;  %2405 = vmatprep.mubr.msk.f32.mxu1 %vm2771_vm0, %v2772_v1 }
0x1e82   :  { %2534 = vmatprep.subr.bf16.mxu1 %v2770_v0 }
0x1e85   :  { %2536 = vmatpush3.bf16.msra.mxu1 %v3032_v4 }
0x1e86   :  { %2543 = vmatprep.subr.bf16.mxu1 %v2770_v0 }
0x1f53   :  { %v1525_v22 = vpop.f32.mrb[12].mxu1 }
0x1f54   :  { %v1530_v23 = vrot.slane %v1525_v22, 2  ;;  %v2385_v24 = vpop.f32.mrb[13].mxu1 }
0x1f56   :  { %v1532_v25 = vadd.f32 %v1530_v23, %v3064_v21 }
0x1f58   :  { %2654 = vtanh.f32 %v1532_v25  ;;  %v2130_v27 = vmul.f32 -1.442695, %v1532_v25 }
0x1f5a   :  { %2656 = vpow2.f32 %v2130_v27 }
0x1f62   :  { %v2655_v26 = vpop.eup %2654 }
0x1f63   :  { %1545 = vrot.lane.b32.xlu1 %v2655_v26, %s2773_s25 }
0x1f64   :  { %v2657_v28 = vpop.eup %2656 }
0x1f65   :  { %v1536_v29 = vadd.f32 1.0, %v2657_v28 }
0x1f67   :  { %2658 = vrcp.f32 %v1536_v29 }
0x1f71   :  { %v2659_v30 = vpop.eup %2658 }
0x1f72   :  { %v1543_v34 = vmul.f32 %v2659_v30, %v1541_v33 }
0x1fd5   :  { %v1546_v31 = vpop.permute.xlu1 %1545 }
0x1fd6   :  { %v1548_v32 = vmul.f32 %v2659_v30, %v1546_v31 }
0x1fd8   :  { %1550 = vrot.lane.b32.xlu0 %v1548_v32, %s2774_s26 }
0x204a   :  { %v1551_v35 = vpop.permute.xlu0 %1550 }
0x204b   :  { %v1553_v36 = vadd.f32 %v1551_v35, %v1543_v34 }
0x204d   :  { %2660 = vtanh.f32 %v1553_v36  ;;  %v1645_v51 = vrot.slane %v1553_v36, 6 }
0x2057   :  { %v2661_v21 = vpop.eup %2660 }
0x2058   :  { %1556 = vrot.lane.b32.xlu1 %v2661_v21, %s2773_s25 }
0x20ca   :  { %v1557_v18 = vpop.permute.xlu1 %1556 }
0x20cb   :  { %v1559_v37 = vmul.f32 %v2659_v30, %v1557_v18 }
0x20cd   :  { %v1561_v38 = vrot.slane %v1559_v37, 6 }
0x20cf   :  { %1562 = vrot.lane.b32.xlu0 %v1561_v38, %s2774_s26 }
0x2141   :  { %v1563_v39 = vpop.permute.xlu0 %1562 }
0x2142   :  { %2395 = vmatmul.mubr.msk.f32.vlgmr.msra.gmra.mrb[14].mxu0 %vm167_vm3, %v1563_v39 }
0x2143   :  { %2539 = vmatpush3.bf16.msra.mxu0 %v3023_v63  ;;  %2416 = vmatprep.mubr.msk.f32.mxu0 %vm2771_vm0, %v2772_v1 }
0x2144   :  { %2540 = vmatprep.subr.bf16.mxu0 %v2770_v0 }
0x2147   :  { %2542 = vmatpush3.bf16.msra.mxu0 %v3032_v4 }
0x2148   :  { %2549 = vmatprep.subr.bf16.mxu0 %v2770_v0 }
0x2215   :  { %v1632_v41 = vpop.f32.mrb[14].mxu0 }
0x2216   :  { %v1636_v42 = vadd.f32 %v1632_v41, %v3062_v19  ;;  %v2396_v43 = vpop.f32.mrb[15].mxu0 }
0x2218   :  { %2662 = vtanh.f32 %v1636_v42  ;;  %v2132_v45 = vmul.f32 -1.442695, %v1636_v42 }
0x221a   :  { %2664 = vpow2.f32 %v2132_v45 }
0x2222   :  { %v2663_v44 = vpop.eup %2662 }
0x2223   :  { %1649 = vrot.lane.b32.xlu1 %v2663_v44, %s2773_s25 }
0x2224   :  { %v2665_v46 = vpop.eup %2664 }
0x2225   :  { %v1640_v47 = vadd.f32 1.0, %v2665_v46 }
0x2227   :  { %2666 = vrcp.f32 %v1640_v47 }
0x2231   :  { %v2667_v48 = vpop.eup %2666 }
0x2232   :  { %v1647_v52 = vmul.f32 %v2667_v48, %v1645_v51 }
0x2295   :  { %v1650_v49 = vpop.permute.xlu1 %1649 }
0x2296   :  { %v1652_v50 = vmul.f32 %v2667_v48, %v1650_v49 }
0x2298   :  { %1654 = vrot.lane.b32.xlu0 %v1652_v50, %s2774_s26 }
0x230a   :  { %v1655_v53 = vpop.permute.xlu0 %1654 }
0x230b   :  { %v1657_v54 = vadd.f32 %v1655_v53, %v1647_v52 }
0x230d   :  { %2668 = vtanh.f32 %v1657_v54 }
0x2317   :  { %v2669_v16 = vpop.eup %2668 }
0x2318   :  { %1660 = vrot.lane.b32.xlu1 %v2669_v16, %s2773_s25  ;;  %v1998_v16 = vld [vmem:[%s3185_s7 + $0x8] sm:$0xff] }
0x238a   :  { %v1661_v56 = vpop.permute.xlu1 %1660 }
0x238b   :  { %v1663_v57 = vmul.f32 %v2667_v48, %v1661_v56  ;;  %v1999_v56 = vld [vmem:[%s3185_s7 + $0x10] sm:$0xff] }
0x238d   :  { %1665 = vrot.lane.b32.xlu0 %v1663_v57, %s2774_s26 }
0x23ff   :  { %v1666_v58 = vpop.permute.xlu0 %1665 }
0x2400   :  { %2406 = vmatmul.mubr.msk.f32.vlgmr.msra.gmra.mrb[14].mxu1 %vm167_vm3, %v1666_v58  ;;  %v2000_v58 = vld [vmem:[%s3185_s7 + $0x18] sm:$0xff] }
0x2401   :  { %2545 = vmatpush3.bf16.msra.mxu1 %v3023_v63  ;;  %2427 = vmatprep.mubr.msk.f32.mxu1 %vm2771_vm0, %v2772_v1 }
0x2402   :  { %2546 = vmatprep.subr.bf16.mxu1 %v2770_v0 }
0x2405   :  { %2548 = vmatpush3.bf16.msra.mxu1 %v3032_v4  ;;  %v1751_v4 = vrot.slane %v1657_v54, 6  ;;  %v1997_v54 = vld [vmem:[%s3185_s7] sm:$0xff]  ;;  %s2775_s7 = smov 96  }
0x2406   :  { %v2550_v57 = vpack.c.bf16 %v1998_v16, %v1997_v54 }
0x24d3   :  { %v1735_v40 = vpop.f32.mrb[14].mxu1 }
0x24d4   :  { %v1740_v59 = vrot.slane %v1735_v40, 6  ;;  %v2407_v60 = vpop.f32.mrb[15].mxu1  ;;  %v2553_v40 = vpack.c.bf16 %v2000_v58, %v1999_v56 }
0x24d6   :  { %v1742_v61 = vadd.f32 %v1740_v59, %v3062_v19 }
0x24d8   :  { %2670 = vtanh.f32 %v1742_v61  ;;  %v2134_v2 = vmul.f32 -1.442695, %v1742_v61 }
0x24da   :  { %2672 = vpow2.f32 %v2134_v2 }
0x24e2   :  { %v2671_v62 = vpop.eup %2670 }
0x24e3   :  { %1755 = vrot.lane.b32.xlu1 %v2671_v62, %s2773_s25 }
0x24e4   :  { %v2673_v3 = vpop.eup %2672 }
0x24e5   :  { %v1746_v63 = vadd.f32 1.0, %v2673_v3 }
0x24e7   :  { %2674 = vrcp.f32 %v1746_v63  ;;  %v2139_v63 = vld [vmem:[#allocation7] ss:$0 sm:$0xff] }
0x24f1   :  { %v2675_v8 = vpop.eup %2674 }
0x24f2   :  { %v1753_v7 = vmul.f32 %v2675_v8, %v1751_v4 }
0x2555   :  { %v1756_v5 = vpop.permute.xlu1 %1755 }
0x2556   :  { %v1758_v6 = vmul.f32 %v2675_v8, %v1756_v5 }
0x2558   :  { %1760 = vrot.lane.b32.xlu0 %v1758_v6, %s2774_s26 }
0x25ca   :  { %v1761_v9 = vpop.permute.xlu0 %1760 }
0x25cb   :  { %v1763_v10 = vadd.f32 %v1761_v9, %v1753_v7 }
0x25cd   :  { %2676 = vtanh.f32 %v1763_v10 }
0x25d7   :  { %v2677_v11 = vpop.eup %2676 }
0x25d8   :  { %1766 = vrot.lane.b32.xlu1 %v2677_v11, %s2773_s25 }
0x264a   :  { %v1767_v13 = vpop.permute.xlu1 %1766 }
0x264b   :  { %v1769_v14 = vmul.f32 %v2675_v8, %v1767_v13 }
0x264d   :  { %v1771_v15 = vrot.slane %v1769_v14, 2 }
0x264f   :  { %1772 = vrot.lane.b32.xlu0 %v1771_v15, %s2774_s26 }
0x26c1   :  { %v1773_v17 = vpop.permute.xlu0 %1772 }
0x26c2   :  { %2417 = vmatmul.mubr.msk.f32.vlgmr.msra.gmra.mrb[16].mxu0 %vm167_vm3, %v1773_v17 }
0x26c3   :  { %2438 = vmatprep.mubr.msk.f32.mxu0 %vm2771_vm0, %v2772_v1  ;;  %v1858_v1 = vrot.slane %v1763_v10, 6  ;;  %2551 = vmatpush3.bf16.msra.mxu0 %v2550_v57 }
0x26c4   :  { %2552 = vmatprep.subr.bf16.mxu0 %v2770_v0 }
0x26c7   :  { %2554 = vmatpush3.bf16.msra.mxu0 %v2553_v40 }
0x2795   :  { %v1842_v20 = vpop.f32.mrb[16].mxu0 }
0x2796   :  { %v1847_v22 = vrot.slane %v1842_v20, 4  ;;  %v2418_v23 = vpop.f32.mrb[17].mxu0 }
0x2798   :  { %v1849_v24 = vadd.f32 %v1847_v22, %v3062_v19 }
0x279a   :  { %2678 = vtanh.f32 %v1849_v24  ;;  %v2136_v26 = vmul.f32 -1.442695, %v1849_v24 }
0x279c   :  { %2680 = vpow2.f32 %v2136_v26 }
0x27a4   :  { %v2679_v25 = vpop.eup %2678 }
0x27a5   :  { %1862 = vrot.lane.b32.xlu1 %v2679_v25, %s2773_s25 }
0x27a6   :  { %v2681_v27 = vpop.eup %2680 }
0x27a7   :  { %v1853_v28 = vadd.f32 1.0, %v2681_v27 }
0x27a9   :  { %2682 = vrcp.f32 %v1853_v28 }
0x27b3   :  { %v2683_v29 = vpop.eup %2682 }
0x27b4   :  { %v1860_v32 = vmul.f32 %v2683_v29, %v1858_v1 }
0x2817   :  { %v1863_v30 = vpop.permute.xlu1 %1862 }
0x2818   :  { %v1865_v31 = vmul.f32 %v2683_v29, %v1863_v30 }
0x281a   :  { %1867 = vrot.lane.b32.xlu0 %v1865_v31, %s2774_s26 }
0x288c   :  { %v1868_v33 = vpop.permute.xlu0 %1867 }
0x288d   :  { %v1870_v34 = vadd.f32 %v1868_v33, %v1860_v32 }
0x288f   :  { %2684 = vtanh.f32 %v1870_v34  ;;  %v1965_v50 = vrot.slane %v1870_v34, 6 }
0x2899   :  { %v2685_v35 = vpop.eup %2684 }
0x289a   :  { %1873 = vrot.lane.b32.xlu1 %v2685_v35, %s2773_s25 }
0x290c   :  { %v1874_v36 = vpop.permute.xlu1 %1873 }
0x290d   :  { %v1876_v21 = vmul.f32 %v2683_v29, %v1874_v36 }
0x290f   :  { %v1878_v18 = vrot.slane %v1876_v21, 4 }
0x2911   :  { %1879 = vrot.lane.b32.xlu0 %v1878_v18, %s2774_s26 }
0x2983   :  { %v1880_v37 = vpop.permute.xlu0 %1879 }
0x2984   :  { %2428 = vmatmul.mubr.msk.f32.vlgmr.msra.gmra.mrb[16].mxu1 %vm167_vm3, %v1880_v37 }
0x2a57   :  { %v1949_v38 = vpop.f32.mrb[16].mxu1 }
0x2a58   :  { %v1954_v39 = vrot.slane %v1949_v38, 2  ;;  %v2429_v41 = vpop.f32.mrb[17].mxu1 }
0x2a5a   :  { %v1956_v42 = vadd.f32 %v1954_v39, %v3062_v19 }
0x2a5c   :  { %2686 = vtanh.f32 %v1956_v42  ;;  %v2138_v44 = vmul.f32 -1.442695, %v1956_v42 }
0x2a5e   :  { %2688 = vpow2.f32 %v2138_v44 }
0x2a66   :  { %v2687_v43 = vpop.eup %2686 }
0x2a67   :  { %1969 = vrot.lane.b32.xlu1 %v2687_v43, %s2773_s25 }
0x2a68   :  { %v2689_v45 = vpop.eup %2688 }
0x2a69   :  { %v1960_v46 = vadd.f32 1.0, %v2689_v45 }
0x2a6b   :  { %2690 = vrcp.f32 %v1960_v46 }
0x2a75   :  { %v2691_v47 = vpop.eup %2690 }
0x2a76   :  { %v1967_v51 = vmul.f32 %v2691_v47, %v1965_v50 }
0x2ad9   :  { %v1970_v48 = vpop.permute.xlu1 %1969 }
0x2ada   :  { %v1972_v49 = vmul.f32 %v2691_v47, %v1970_v48 }
0x2adc   :  { %1974 = vrot.lane.b32.xlu0 %v1972_v49, %s2774_s26 }
0x2b4e   :  { %v1975_v52 = vpop.permute.xlu0 %1974 }
0x2b4f   :  { %v1977_v53 = vadd.f32 %v1975_v52, %v1967_v51 }
0x2b51   :  { %2692 = vtanh.f32 %v1977_v53 }
0x2b5b   :  { %v2693_v19 = vpop.eup %2692 }
0x2b5c   :  { %1980 = vrot.lane.b32.xlu1 %v2693_v19, %s2773_s25  ;;  %s2091_s25 = sshll.u32 %s2776_s2, 4  ;;  %s2092_s25 = int_to_ptr.vmem [resolvable:$true] %s2091_s25 }
0x2b5d   :  { %p2743_p3 = scmp.lt.s32.totalorder %s2092_s25, %s2092_s25 }
0x2b60   :  { %1015 = vrot.lane.b32.xlu1 %v3046_v12, %s2774_s26 }
0x2bce   :  { %v1981_v59 = vpop.permute.xlu1 %1980 }
0x2bcf   :  { %v1983_v60 = vmul.f32 %v2691_v47, %v1981_v59 }
0x2bd1   :  { %v2008_v61 = vrot.slane %v1983_v60, 6  ;;  %1985 = vrot.lane.b32.xlu1 %v1983_v60, %s2774_s26 }
0x2bd2   :  { %v1016_v62 = vpop.permute.xlu1 %1015 }
0x2bd3   :  { %1019 = vst.msk [vmem:[#allocation2 - $0x6] sm:$0xc0] %vm1018_vm7, %v1016_v62  ;;  %2009 = vrot.lane.b32.xlu0 %v2008_v61, %s2774_s26  ;;  %s2738_s26 = scalar_lea.vmem %s2092_s25, 32 }
0x2bd4   :  { %p2739_p2 = scmp.ne.s32.totalorder %s2092_s25, %s2738_s26  ;;  %p2744_p4 = scmp.lt.s32.totalorder %s2738_s26, %s2738_s26 }
0x2bd6   :  { %p2745_p5 = por %p2744_p4, %p2743_p3 }
0x2bd7   :  { %1021 = vrot.lane.b32.xlu0 %v3001_v55, %s2775_s7 }
0x2bd8   :  { %p2746_p6 = pnand %p2745_p5, %p2739_p2 }
0x2bdb   :  { %1990 = vrot.lane.b32.xlu0 %v1977_v53, %s2775_s7 }
0x2c43   :  { %v1986_v0 = vpop.permute.xlu1 %1985 }
0x2c44   :  { %1988 = vst.msk [vmem:[#allocation2 - $0x4] sm:$0xc0] %vm1018_vm7, %v1986_v0 }
0x2c45   :  { %v2010_v12 = vpop.permute.xlu0 %2009 }
0x2c46   :  { %2439 = vmatmul.mubr.msk.f32.vlgmr.msra.gmra.mrb[18].mxu0 %vm167_vm3, %v2010_v12 }
0x2c49   :  { %v1022_v2 = vpop.permute.xlu0 %1021 }
0x2c4a   :  { %1024 = vst.msk [vmem:[#allocation3 - $0x6] sm:$0xc0] %vm1018_vm7, %v1022_v2 }
0x2c4d   :  { %v1991_v3 = vpop.permute.xlu0 %1990 }
0x2c4e   :  { %1993 = vst.msk [vmem:[#allocation3 - $0x4] sm:$0xc0] %vm1018_vm7, %v1991_v3 }
0x2d19   :  { %v2079_v8 = vpop.f32.mrb[18].mxu0 }
0x2d1a   :  { %v2080_v5 = vadd.f32 %v2139_v63, %v2079_v8  ;;  %v2440_v55 = vpop.f32.mrb[19].mxu0 }
0x2d1c   :  { %2084 = vst.msk [vmem:[#allocation9] sm:$0x3] %vm2083_vm8, %v2080_v5 }
0x2d1d   :  { %2749 = shalt.err (!%p2746_p6)
}
0x2d1e   :  { %s2750_s28 = scalar_lea.hbm %s3187_s9, 32 }
0x2d1f   :  { %p2751_p7 = scmp.ne.s32.totalorder %s3187_s9, %s2750_s28  ;;  %p2754_p8 = scmp.lt.u32.totalorder %s2750_s28, %s3187_s9 }
0x2d21   :  { %p2756_p9 = pnand %p2754_p8, %p2751_p7 }
0x2d23   :  { %2759 = shalt.err (!%p2756_p9)
}
0x2d24   :  { %2094 = dma.vmem_to_hbm [thread:$0]  %s2092_s25, 32, %s3187_s9, [#allocation6]  }
0x2d25   :  { %2764 = dma.done.wait [#allocation6], 32  }
0x2d26   :  { %2765 = vsyncadd [#allocation6], 4294967264 }
0x2d27   :  { %2098 = vsyncpa [#allocation5], 1 }
0x2d28   :  { %2099 = vsyncpa [#allocation8], 1 }
0x2d29   :  { %2100 = vsyncpa [#allocation6], 1 }

</bundles_post_ra>
